<compile_context>
chip_gen: v5e
topology: v5e:2x2
jax: 0.10.0
libtpu: 0.0.40
codegen_flags: <defaults>
</compile_context>

<pallas_src>
import functools

import jax
import jax.numpy as jnp
from jax.experimental import pallas as pl
from jax.experimental.pallas import tpu as pltpu

LANE = 128      # lane width: pad feature dims to this
SUBLANE = 8     # sublane count: pad row counts to this


def _rup(v, m):
    return ((v + m - 1) // m) * m


# ----------------------------------------------------------------------------
# Fused Pallas kernel: entire GEN forward, everything resident in VMEM.
# ----------------------------------------------------------------------------
def _gen_fused_kernel(
    x_ref, ea_ref, s_src_ref, s_dst_ref, pool_ref,
    aw1_ref, ab1_ref, aw2_ref, ab2_ref,
    bw1_ref, bb1_ref, bw2_ref, bb2_ref,
    ct_ref, cw1_ref, cb1_ref, cw2_ref, cb2_ref,
    l1w_ref, l1b_ref, l2w_ref, l2b_ref,
    out_ref, *, num_layers,
):
    f32, bf16 = jnp.float32, jnp.bfloat16

    def lin(h, w_bf16, b_f32, relu):
        # bf16 MXU matmul, f32 accumulate, f32 bias add (b is (1, F)).
        y = jnp.dot(h.astype(bf16), w_bf16, preferred_element_type=f32) + b_f32
        return jnp.maximum(y, 0.0) if relu else y

    # --- atom / bond encoders (Linear+ReLU x2) -------------------------------
    h = lin(lin(x_ref[...], aw1_ref[...], ab1_ref[...], True),
            aw2_ref[...], ab2_ref[...], True)                          # [N, H]
    e = lin(lin(ea_ref[...], bw1_ref[...], bb1_ref[...], True),
            bw2_ref[...], bb2_ref[...], True)                          # [E, H]

    s_src = s_src_ref[...]                                             # [E, N] bf16
    s_dst = s_dst_ref[...]                                             # [E, N] bf16
    edge_contract = (((0,), (0,)), ((), ()))                           # s_dst.T @ (.)

    # --- GENConv layers: softmax aggregation (eps=1e-7) + residual + MLP -----
    for l in range(num_layers):
        t = ct_ref[l]                                                  # SMEM scalar
        x_j = jnp.dot(s_src, h.astype(bf16), preferred_element_type=f32)   # [E, H]
        msg = jnp.maximum(x_j + e, 0.0) + 1e-7
        z = t * msg
        # Global per-channel shift: numerical stability only, per-segment
        # softmax weights are invariant to it.
        z = z - jnp.max(z, axis=0, keepdims=True)
        ez = jnp.exp(z)
        # Segment sums over destination nodes: denom = s_dst.T @ ez  (no a_mat).
        denom = jax.lax.dot_general(s_dst, ez.astype(bf16), edge_contract,
                                    preferred_element_type=f32)        # [N, H]
        denom_e = jnp.dot(s_dst, denom.astype(bf16),
                          preferred_element_type=f32)                  # [E, H]
        # TODO(synk): PyG uses a per-segment max; clamp only guards against a
        # whole segment underflowing relative to the global max.
        w = ez * pl.reciprocal(jnp.maximum(denom_e, 1e-12), approx=True)
        agg = jax.lax.dot_general(s_dst, (w * msg).astype(bf16), edge_contract,
                                  preferred_element_type=f32)          # [N, H]
        h = agg + h                                                    # residual
        # conv MLP: Linear(H,2H)+BN(folded, eval) -> ReLU -> Linear(2H,H)
        h = lin(h, cw1_ref[l], cb1_ref[l], True)
        # inter-layer ReLU of the outer network fused into all but last layer
        h = lin(h, cw2_ref[l], cb2_ref[l], l < num_layers - 1)

    # --- global_add_pool (bias-less matmul) + head MLP ------------------------
    pooled = jnp.dot(pool_ref[...], h.astype(bf16), preferred_element_type=f32)
    o = lin(pooled, l1w_ref[...], l1b_ref[...], True)
    o = lin(o, l2w_ref[...], l2b_ref[...], False)
    out_ref[...] = o.astype(out_ref.dtype)


# ----------------------------------------------------------------------------
# Parameter initialization (deterministic, PyTorch-default-style)
# ----------------------------------------------------------------------------
def init_linear(key, fan_in, fan_out):
    kw, kb = jax.random.split(key)
    bound = 1.0 / float(fan_in) ** 0.5
    w = jax.random.uniform(kw, (fan_in, fan_out), jnp.float32, -bound, bound)
    b = jax.random.uniform(kb, (fan_out,), jnp.float32, -bound, bound)
    return w, b


def init_params(key, in_channels, edge_dim, hidden, num_layers, out_channels):
    keys = jax.random.split(key, 8 + 2 * num_layers)
    params = {}
    params["atom"] = [init_linear(keys[0], in_channels, hidden),
                      init_linear(keys[1], hidden, hidden)]
    params["bond"] = [init_linear(keys[2], edge_dim, hidden),
                      init_linear(keys[3], hidden, hidden)]

    convs = []
    bn_eps = 1e-5
    for i in range(num_layers):
        w1, b1 = init_linear(keys[4 + 2 * i], hidden, 2 * hidden)
        w2, b2 = init_linear(keys[5 + 2 * i], 2 * hidden, hidden)
        # BatchNorm1d(2*hidden), eval mode, PyTorch init running stats
        # (mean=0, var=1, gamma=1, beta=0) folded into the first linear.
        # TODO(synk): real checkpoints must fold their own running stats.
        gamma = jnp.ones((2 * hidden,), jnp.float32)
        beta = jnp.zeros((2 * hidden,), jnp.float32)
        r_mean = jnp.zeros((2 * hidden,), jnp.float32)
        r_var = jnp.ones((2 * hidden,), jnp.float32)
        scale = gamma / jnp.sqrt(r_var + bn_eps)
        convs.append({
            "t": jnp.array([1.0], jnp.float32),           # learn_t init
            "w1_bn": w1 * scale[None, :],
            "b1_bn": (b1 - r_mean) * scale + beta,
            "w2": w2, "b2": b2,
        })
    params["convs"] = convs
    params["lin1"] = init_linear(keys[4 + 2 * num_layers], hidden, hidden)
    params["lin2"] = init_linear(keys[5 + 2 * num_layers], hidden, out_channels)
    return params


# ----------------------------------------------------------------------------
# Jitted forward: build one-hots, pad to lane/sublane-aligned shapes, one call.
# ----------------------------------------------------------------------------
@functools.partial(jax.jit, static_argnames=("num_graphs",))
def gen_forward(params, x, edge_attr, src, dst, batch, *, num_graphs):
    f32, bf16 = jnp.float32, jnp.bfloat16
    n, in_c = x.shape
    n_edges, edge_c = edge_attr.shape
    hidden = params["convs"][0]["w1_bn"].shape[0]
    out_channels = params["lin2"][0].shape[1]
    num_layers = len(params["convs"])

    H = _rup(hidden, LANE)
    H2 = _rup(2 * hidden, LANE)
    IN = _rup(in_c, LANE)
    EC = _rup(edge_c, LANE)
    OC = _rup(out_channels, LANE)
    NP = _rup(n, SUBLANE)
    EP = _rup(n_edges, SUBLANE)
    GP = _rup(num_graphs, SUBLANE)

    def pad(a, rows, cols):
        return jnp.pad(a, ((0, rows - a.shape[0]), (0, cols - a.shape[1])))

    def w_p(w, rows, cols):                      # weights -> bf16, padded w/ zeros
        return pad(w, rows, cols).astype(bf16)

    def b_p(b, cols):                            # biases -> f32 (1, cols)
        return jnp.pad(b, (0, cols - b.shape[0])).reshape(1, cols).astype(f32)

    # inputs + one-hot gather/scatter operators (exact in bf16)
    x_p = pad(x.astype(f32), NP, IN)
    ea_p = pad(edge_attr.astype(f32), EP, EC)
    s_src = pad(jax.nn.one_hot(src, n, dtype=bf16), EP, NP)       # [E, N]
    s_dst = pad(jax.nn.one_hot(dst, n, dtype=bf16), EP, NP)       # [E, N]
    pool = pad(jax.nn.one_hot(batch, num_graphs, dtype=bf16).T, GP, NP)  # [G, N]

    (aw1, ab1), (aw2, ab2) = params["atom"]
    (bw1, bb1), (bw2, bb2) = params["bond"]
    convs = params["convs"]
    ct = jnp.stack([c["t"][0] for c in convs]).astype(f32)                 # [L]
    cw1 = jnp.stack([w_p(c["w1_bn"], H, H2) for c in convs])               # [L,H,H2]
    cb1 = jnp.stack([b_p(c["b1_bn"], H2) for c in convs])                  # [L,1,H2]
    cw2 = jnp.stack([w_p(c["w2"], H2, H) for c in convs])                  # [L,H2,H]
    cb2 = jnp.stack([b_p(c["b2"], H) for c in convs])                      # [L,1,H]
    (l1w, l1b), (l2w, l2b) = params["lin1"], params["lin2"]

    args = [
        x_p, ea_p, s_src, s_dst, pool,
        w_p(aw1, IN, H), b_p(ab1, H), w_p(aw2, H, H), b_p(ab2, H),
        w_p(bw1, EC, H), b_p(bb1, H), w_p(bw2, H, H), b_p(bb2, H),
        ct, cw1, cb1, cw2, cb2,
        w_p(l1w, H, H), b_p(l1b, H), w_p(l2w, H, OC), b_p(l2b, OC),
    ]

    vmem = pl.BlockSpec(memory_space=pltpu.MemorySpace.VMEM)
    smem = pl.BlockSpec(memory_space=pltpu.MemorySpace.SMEM)

    out = pl.pallas_call(
        functools.partial(_gen_fused_kernel, num_layers=num_layers),
        out_shape=jax.ShapeDtypeStruct((GP, OC), f32),
        in_specs=[vmem] * 13 + [smem] + [vmem] * 8,
        out_specs=vmem,
    )(*args)
    return out[:num_graphs, :out_channels]


# ----------------------------------------------------------------------------
if __name__ == "__main__":
    N, E, G = 16, 32, 2                      # nodes, edges, graphs
    in_channels, edge_dim = 8, 6
    hidden, num_layers, out_channels = 32, 3, 4

    key = jax.random.PRNGKey(0)
    k_x, k_ea, k_src, k_dst, k_p = jax.random.split(key, 5)

    x = jax.random.normal(k_x, (N, in_channels), jnp.float32)
    edge_attr = jax.random.normal(k_ea, (E, edge_dim), jnp.float32)
    src = jax.random.randint(k_src, (E,), 0, N)
    dst = jax.random.randint(k_dst, (E,), 0, N)
    batch = jnp.concatenate([jnp.zeros((N // 2,), jnp.int32),
                             jnp.ones((N - N // 2,), jnp.int32)])

    params = init_params(k_p, in_channels, edge_dim, hidden, num_layers,
                         out_channels)

    out = gen_forward(params, x, edge_attr, src, dst, batch, num_graphs=G)
    out = jax.block_until_ready(out)
    assert out.shape == (G, out_channels)
    assert bool(jnp.all(jnp.isfinite(out)))
    print("KERNEL_OK")
</pallas_src>

<mosaic_0001>
module attributes {stable_mosaic.version = 11 : i64} {
  func.func @_gen_fused_kernel(%arg0: memref<16x128xf32, #tpu.memory_space<vmem>>, %arg1: memref<32x128xf32, #tpu.memory_space<vmem>>, %arg2: memref<32x16xbf16, #tpu.memory_space<vmem>>, %arg3: memref<32x16xbf16, #tpu.memory_space<vmem>>, %arg4: memref<8x16xbf16, #tpu.memory_space<vmem>>, %arg5: memref<128x128xbf16, #tpu.memory_space<vmem>>, %arg6: memref<1x128xf32, #tpu.memory_space<vmem>>, %arg7: memref<128x128xbf16, #tpu.memory_space<vmem>>, %arg8: memref<1x128xf32, #tpu.memory_space<vmem>>, %arg9: memref<128x128xbf16, #tpu.memory_space<vmem>>, %arg10: memref<1x128xf32, #tpu.memory_space<vmem>>, %arg11: memref<128x128xbf16, #tpu.memory_space<vmem>>, %arg12: memref<1x128xf32, #tpu.memory_space<vmem>>, %arg13: memref<3xf32, #tpu.memory_space<smem>>, %arg14: memref<3x128x128xbf16, #tpu.memory_space<vmem>>, %arg15: memref<3x1x128xf32, #tpu.memory_space<vmem>>, %arg16: memref<3x128x128xbf16, #tpu.memory_space<vmem>>, %arg17: memref<3x1x128xf32, #tpu.memory_space<vmem>>, %arg18: memref<128x128xbf16, #tpu.memory_space<vmem>>, %arg19: memref<1x128xf32, #tpu.memory_space<vmem>>, %arg20: memref<128x128xbf16, #tpu.memory_space<vmem>>, %arg21: memref<1x128xf32, #tpu.memory_space<vmem>>, %arg22: memref<8x128xf32, #tpu.memory_space<vmem>>) attributes {dimension_semantics = [], scalar_prefetch = 0 : i64, scratch_operands = 0 : i64, tpu.core_type = #tpu.core_type<tc>} {
    %c0 = arith.constant 0 : index
    %c0_0 = arith.constant 0 : index
    %0 = vector.load %arg0[%c0, %c0_0] : memref<16x128xf32, #tpu.memory_space<vmem>>, vector<16x128xf32>
    %c0_1 = arith.constant 0 : index
    %c0_2 = arith.constant 0 : index
    %1 = vector.load %arg5[%c0_1, %c0_2] : memref<128x128xbf16, #tpu.memory_space<vmem>>, vector<128x128xbf16>
    %c0_3 = arith.constant 0 : index
    %c0_4 = arith.constant 0 : index
    %2 = vector.load %arg6[%c0_3, %c0_4] : memref<1x128xf32, #tpu.memory_space<vmem>>, vector<1x128xf32>
    %3 = arith.truncf %0 : vector<16x128xf32> to vector<16x128xbf16>
    %cst = arith.constant dense<0.000000e+00> : vector<16x128xf32>
    %4 = tpu.matmul %3, %1, %cst {dimension_numbers = #tpu.dot_dimension_numbers<[1], [0], [0], [1], [0, 0, 1, 1], [], []>} : vector<16x128xbf16>, vector<128x128xbf16>, vector<16x128xf32> -> vector<16x128xf32>
    %5 = vector.broadcast %2 : vector<1x128xf32> to vector<16x128xf32>
    %6 = arith.addf %4, %5 : vector<16x128xf32>
    %cst_5 = arith.constant 0.000000e+00 : f32
    %7 = vector.broadcast %cst_5 : f32 to vector<16x128xf32>
    %8 = arith.maximumf %6, %7 : vector<16x128xf32>
    %c0_6 = arith.constant 0 : index
    %c0_7 = arith.constant 0 : index
    %9 = vector.load %arg7[%c0_6, %c0_7] : memref<128x128xbf16, #tpu.memory_space<vmem>>, vector<128x128xbf16>
    %c0_8 = arith.constant 0 : index
    %c0_9 = arith.constant 0 : index
    %10 = vector.load %arg8[%c0_8, %c0_9] : memref<1x128xf32, #tpu.memory_space<vmem>>, vector<1x128xf32>
    %11 = arith.truncf %8 : vector<16x128xf32> to vector<16x128xbf16>
    %cst_10 = arith.constant dense<0.000000e+00> : vector<16x128xf32>
    %12 = tpu.matmul %11, %9, %cst_10 {dimension_numbers = #tpu.dot_dimension_numbers<[1], [0], [0], [1], [0, 0, 1, 1], [], []>} : vector<16x128xbf16>, vector<128x128xbf16>, vector<16x128xf32> -> vector<16x128xf32>
    %13 = vector.broadcast %10 : vector<1x128xf32> to vector<16x128xf32>
    %14 = arith.addf %12, %13 : vector<16x128xf32>
    %cst_11 = arith.constant 0.000000e+00 : f32
    %15 = vector.broadcast %cst_11 : f32 to vector<16x128xf32>
    %16 = arith.maximumf %14, %15 : vector<16x128xf32>
    %c0_12 = arith.constant 0 : index
    %c0_13 = arith.constant 0 : index
    %17 = vector.load %arg1[%c0_12, %c0_13] : memref<32x128xf32, #tpu.memory_space<vmem>>, vector<32x128xf32>
    %c0_14 = arith.constant 0 : index
    %c0_15 = arith.constant 0 : index
    %18 = vector.load %arg9[%c0_14, %c0_15] : memref<128x128xbf16, #tpu.memory_space<vmem>>, vector<128x128xbf16>
    %c0_16 = arith.constant 0 : index
    %c0_17 = arith.constant 0 : index
    %19 = vector.load %arg10[%c0_16, %c0_17] : memref<1x128xf32, #tpu.memory_space<vmem>>, vector<1x128xf32>
    %20 = arith.truncf %17 : vector<32x128xf32> to vector<32x128xbf16>
    %cst_18 = arith.constant dense<0.000000e+00> : vector<32x128xf32>
    %21 = tpu.matmul %20, %18, %cst_18 {dimension_numbers = #tpu.dot_dimension_numbers<[1], [0], [0], [1], [0, 0, 1, 1], [], []>} : vector<32x128xbf16>, vector<128x128xbf16>, vector<32x128xf32> -> vector<32x128xf32>
    %22 = vector.broadcast %19 : vector<1x128xf32> to vector<32x128xf32>
    %23 = arith.addf %21, %22 : vector<32x128xf32>
    %cst_19 = arith.constant 0.000000e+00 : f32
    %24 = vector.broadcast %cst_19 : f32 to vector<32x128xf32>
    %25 = arith.maximumf %23, %24 : vector<32x128xf32>
    %c0_20 = arith.constant 0 : index
    %c0_21 = arith.constant 0 : index
    %26 = vector.load %arg11[%c0_20, %c0_21] : memref<128x128xbf16, #tpu.memory_space<vmem>>, vector<128x128xbf16>
    %c0_22 = arith.constant 0 : index
    %c0_23 = arith.constant 0 : index
    %27 = vector.load %arg12[%c0_22, %c0_23] : memref<1x128xf32, #tpu.memory_space<vmem>>, vector<1x128xf32>
    %28 = arith.truncf %25 : vector<32x128xf32> to vector<32x128xbf16>
    %cst_24 = arith.constant dense<0.000000e+00> : vector<32x128xf32>
    %29 = tpu.matmul %28, %26, %cst_24 {dimension_numbers = #tpu.dot_dimension_numbers<[1], [0], [0], [1], [0, 0, 1, 1], [], []>} : vector<32x128xbf16>, vector<128x128xbf16>, vector<32x128xf32> -> vector<32x128xf32>
    %30 = vector.broadcast %27 : vector<1x128xf32> to vector<32x128xf32>
    %31 = arith.addf %29, %30 : vector<32x128xf32>
    %cst_25 = arith.constant 0.000000e+00 : f32
    %32 = vector.broadcast %cst_25 : f32 to vector<32x128xf32>
    %33 = arith.maximumf %31, %32 : vector<32x128xf32>
    %c0_26 = arith.constant 0 : index
    %c0_27 = arith.constant 0 : index
    %34 = vector.load %arg2[%c0_26, %c0_27] : memref<32x16xbf16, #tpu.memory_space<vmem>>, vector<32x16xbf16>
    %c0_28 = arith.constant 0 : index
    %c0_29 = arith.constant 0 : index
    %35 = vector.load %arg3[%c0_28, %c0_29] : memref<32x16xbf16, #tpu.memory_space<vmem>>, vector<32x16xbf16>
    %c0_30 = arith.constant 0 : index
    %36 = memref.load %arg13[%c0_30] : memref<3xf32, #tpu.memory_space<smem>>
    %37 = arith.truncf %16 : vector<16x128xf32> to vector<16x128xbf16>
    %cst_31 = arith.constant dense<0.000000e+00> : vector<32x128xf32>
    %38 = tpu.matmul %34, %37, %cst_31 {dimension_numbers = #tpu.dot_dimension_numbers<[1], [0], [0], [1], [0, 0, 1, 1], [], []>} : vector<32x16xbf16>, vector<16x128xbf16>, vector<32x128xf32> -> vector<32x128xf32>
    %39 = arith.addf %38, %33 : vector<32x128xf32>
    %cst_32 = arith.constant 0.000000e+00 : f32
    %40 = vector.broadcast %cst_32 : f32 to vector<32x128xf32>
    %41 = arith.maximumf %39, %40 : vector<32x128xf32>
    %cst_33 = arith.constant 1.000000e-07 : f32
    %42 = vector.broadcast %cst_33 : f32 to vector<32x128xf32>
    %43 = arith.addf %41, %42 : vector<32x128xf32>
    %44 = vector.broadcast %36 : f32 to vector<32x128xf32>
    %45 = arith.mulf %44, %43 : vector<32x128xf32>
    %cst_34 = arith.constant dense<0xFF800000> : vector<128xf32>
    %46 = vector.multi_reduction <maximumf>, %45, %cst_34 [0] : vector<32x128xf32> to vector<128xf32>
    %47 = vector.shape_cast %46 : vector<128xf32> to vector<1x128xf32>
    %48 = vector.broadcast %47 : vector<1x128xf32> to vector<32x128xf32>
    %49 = arith.subf %45, %48 : vector<32x128xf32>
    %50 = math.exp %49 : vector<32x128xf32>
    %51 = arith.truncf %50 : vector<32x128xf32> to vector<32x128xbf16>
    %cst_35 = arith.constant dense<0.000000e+00> : vector<16x128xf32>
    %52 = tpu.matmul %35, %51, %cst_35 {dimension_numbers = #tpu.dot_dimension_numbers<[0], [0], [1], [1], [0, 1, 1, 1], [], []>} : vector<32x16xbf16>, vector<32x128xbf16>, vector<16x128xf32> -> vector<16x128xf32>
    %53 = arith.truncf %52 : vector<16x128xf32> to vector<16x128xbf16>
    %cst_36 = arith.constant dense<0.000000e+00> : vector<32x128xf32>
    %54 = tpu.matmul %35, %53, %cst_36 {dimension_numbers = #tpu.dot_dimension_numbers<[1], [0], [0], [1], [0, 0, 1, 1], [], []>} : vector<32x16xbf16>, vector<16x128xbf16>, vector<32x128xf32> -> vector<32x128xf32>
    %cst_37 = arith.constant 9.99999996E-13 : f32
    %55 = vector.broadcast %cst_37 : f32 to vector<32x128xf32>
    %56 = arith.maximumf %54, %55 : vector<32x128xf32>
    %57 = tpu.reciprocal %56 {approx = true} : vector<32x128xf32> -> vector<32x128xf32>
    %58 = arith.mulf %50, %57 : vector<32x128xf32>
    %59 = arith.mulf %58, %43 : vector<32x128xf32>
    %60 = arith.truncf %59 : vector<32x128xf32> to vector<32x128xbf16>
    %cst_38 = arith.constant dense<0.000000e+00> : vector<16x128xf32>
    %61 = tpu.matmul %35, %60, %cst_38 {dimension_numbers = #tpu.dot_dimension_numbers<[0], [0], [1], [1], [0, 1, 1, 1], [], []>} : vector<32x16xbf16>, vector<32x128xbf16>, vector<16x128xf32> -> vector<16x128xf32>
    %62 = arith.addf %61, %16 : vector<16x128xf32>
    %c0_39 = arith.constant 0 : index
    %c0_40 = arith.constant 0 : index
    %c0_41 = arith.constant 0 : index
    %63 = vector.load %arg14[%c0_39, %c0_40, %c0_41] : memref<3x128x128xbf16, #tpu.memory_space<vmem>>, vector<1x128x128xbf16>
    %64 = vector.shape_cast %63 : vector<1x128x128xbf16> to vector<128x128xbf16>
    %c0_42 = arith.constant 0 : index
    %c0_43 = arith.constant 0 : index
    %c0_44 = arith.constant 0 : index
    %65 = vector.load %arg15[%c0_42, %c0_43, %c0_44] : memref<3x1x128xf32, #tpu.memory_space<vmem>>, vector<1x1x128xf32>
    %66 = vector.shape_cast %65 : vector<1x1x128xf32> to vector<1x128xf32>
    %67 = arith.truncf %62 : vector<16x128xf32> to vector<16x128xbf16>
    %cst_45 = arith.constant dense<0.000000e+00> : vector<16x128xf32>
    %68 = tpu.matmul %67, %64, %cst_45 {dimension_numbers = #tpu.dot_dimension_numbers<[1], [0], [0], [1], [0, 0, 1, 1], [], []>} : vector<16x128xbf16>, vector<128x128xbf16>, vector<16x128xf32> -> vector<16x128xf32>
    %69 = vector.broadcast %66 : vector<1x128xf32> to vector<16x128xf32>
    %70 = arith.addf %68, %69 : vector<16x128xf32>
    %cst_46 = arith.constant 0.000000e+00 : f32
    %71 = vector.broadcast %cst_46 : f32 to vector<16x128xf32>
    %72 = arith.maximumf %70, %71 : vector<16x128xf32>
    %c0_47 = arith.constant 0 : index
    %c0_48 = arith.constant 0 : index
    %c0_49 = arith.constant 0 : index
    %73 = vector.load %arg16[%c0_47, %c0_48, %c0_49] : memref<3x128x128xbf16, #tpu.memory_space<vmem>>, vector<1x128x128xbf16>
    %74 = vector.shape_cast %73 : vector<1x128x128xbf16> to vector<128x128xbf16>
    %c0_50 = arith.constant 0 : index
    %c0_51 = arith.constant 0 : index
    %c0_52 = arith.constant 0 : index
    %75 = vector.load %arg17[%c0_50, %c0_51, %c0_52] : memref<3x1x128xf32, #tpu.memory_space<vmem>>, vector<1x1x128xf32>
    %76 = vector.shape_cast %75 : vector<1x1x128xf32> to vector<1x128xf32>
    %77 = arith.truncf %72 : vector<16x128xf32> to vector<16x128xbf16>
    %cst_53 = arith.constant dense<0.000000e+00> : vector<16x128xf32>
    %78 = tpu.matmul %77, %74, %cst_53 {dimension_numbers = #tpu.dot_dimension_numbers<[1], [0], [0], [1], [0, 0, 1, 1], [], []>} : vector<16x128xbf16>, vector<128x128xbf16>, vector<16x128xf32> -> vector<16x128xf32>
    %79 = vector.broadcast %76 : vector<1x128xf32> to vector<16x128xf32>
    %80 = arith.addf %78, %79 : vector<16x128xf32>
    %cst_54 = arith.constant 0.000000e+00 : f32
    %81 = vector.broadcast %cst_54 : f32 to vector<16x128xf32>
    %82 = arith.maximumf %80, %81 : vector<16x128xf32>
    %c1 = arith.constant 1 : index
    %83 = memref.load %arg13[%c1] : memref<3xf32, #tpu.memory_space<smem>>
    %84 = arith.truncf %82 : vector<16x128xf32> to vector<16x128xbf16>
    %cst_55 = arith.constant dense<0.000000e+00> : vector<32x128xf32>
    %85 = tpu.matmul %34, %84, %cst_55 {dimension_numbers = #tpu.dot_dimension_numbers<[1], [0], [0], [1], [0, 0, 1, 1], [], []>} : vector<32x16xbf16>, vector<16x128xbf16>, vector<32x128xf32> -> vector<32x128xf32>
    %86 = arith.addf %85, %33 : vector<32x128xf32>
    %cst_56 = arith.constant 0.000000e+00 : f32
    %87 = vector.broadcast %cst_56 : f32 to vector<32x128xf32>
    %88 = arith.maximumf %86, %87 : vector<32x128xf32>
    %cst_57 = arith.constant 1.000000e-07 : f32
    %89 = vector.broadcast %cst_57 : f32 to vector<32x128xf32>
    %90 = arith.addf %88, %89 : vector<32x128xf32>
    %91 = vector.broadcast %83 : f32 to vector<32x128xf32>
    %92 = arith.mulf %91, %90 : vector<32x128xf32>
    %cst_58 = arith.constant dense<0xFF800000> : vector<128xf32>
    %93 = vector.multi_reduction <maximumf>, %92, %cst_58 [0] : vector<32x128xf32> to vector<128xf32>
    %94 = vector.shape_cast %93 : vector<128xf32> to vector<1x128xf32>
    %95 = vector.broadcast %94 : vector<1x128xf32> to vector<32x128xf32>
    %96 = arith.subf %92, %95 : vector<32x128xf32>
    %97 = math.exp %96 : vector<32x128xf32>
    %98 = arith.truncf %97 : vector<32x128xf32> to vector<32x128xbf16>
    %cst_59 = arith.constant dense<0.000000e+00> : vector<16x128xf32>
    %99 = tpu.matmul %35, %98, %cst_59 {dimension_numbers = #tpu.dot_dimension_numbers<[0], [0], [1], [1], [0, 1, 1, 1], [], []>} : vector<32x16xbf16>, vector<32x128xbf16>, vector<16x128xf32> -> vector<16x128xf32>
    %100 = arith.truncf %99 : vector<16x128xf32> to vector<16x128xbf16>
    %cst_60 = arith.constant dense<0.000000e+00> : vector<32x128xf32>
    %101 = tpu.matmul %35, %100, %cst_60 {dimension_numbers = #tpu.dot_dimension_numbers<[1], [0], [0], [1], [0, 0, 1, 1], [], []>} : vector<32x16xbf16>, vector<16x128xbf16>, vector<32x128xf32> -> vector<32x128xf32>
    %cst_61 = arith.constant 9.99999996E-13 : f32
    %102 = vector.broadcast %cst_61 : f32 to vector<32x128xf32>
    %103 = arith.maximumf %101, %102 : vector<32x128xf32>
    %104 = tpu.reciprocal %103 {approx = true} : vector<32x128xf32> -> vector<32x128xf32>
    %105 = arith.mulf %97, %104 : vector<32x128xf32>
    %106 = arith.mulf %105, %90 : vector<32x128xf32>
    %107 = arith.truncf %106 : vector<32x128xf32> to vector<32x128xbf16>
    %cst_62 = arith.constant dense<0.000000e+00> : vector<16x128xf32>
    %108 = tpu.matmul %35, %107, %cst_62 {dimension_numbers = #tpu.dot_dimension_numbers<[0], [0], [1], [1], [0, 1, 1, 1], [], []>} : vector<32x16xbf16>, vector<32x128xbf16>, vector<16x128xf32> -> vector<16x128xf32>
    %109 = arith.addf %108, %82 : vector<16x128xf32>
    %c1_63 = arith.constant 1 : index
    %c0_64 = arith.constant 0 : index
    %c0_65 = arith.constant 0 : index
    %110 = vector.load %arg14[%c1_63, %c0_64, %c0_65] : memref<3x128x128xbf16, #tpu.memory_space<vmem>>, vector<1x128x128xbf16>
    %111 = vector.shape_cast %110 : vector<1x128x128xbf16> to vector<128x128xbf16>
    %c1_66 = arith.constant 1 : index
    %c0_67 = arith.constant 0 : index
    %c0_68 = arith.constant 0 : index
    %112 = vector.load %arg15[%c1_66, %c0_67, %c0_68] : memref<3x1x128xf32, #tpu.memory_space<vmem>>, vector<1x1x128xf32>
    %113 = vector.shape_cast %112 : vector<1x1x128xf32> to vector<1x128xf32>
    %114 = arith.truncf %109 : vector<16x128xf32> to vector<16x128xbf16>
    %cst_69 = arith.constant dense<0.000000e+00> : vector<16x128xf32>
    %115 = tpu.matmul %114, %111, %cst_69 {dimension_numbers = #tpu.dot_dimension_numbers<[1], [0], [0], [1], [0, 0, 1, 1], [], []>} : vector<16x128xbf16>, vector<128x128xbf16>, vector<16x128xf32> -> vector<16x128xf32>
    %116 = vector.broadcast %113 : vector<1x128xf32> to vector<16x128xf32>
    %117 = arith.addf %115, %116 : vector<16x128xf32>
    %cst_70 = arith.constant 0.000000e+00 : f32
    %118 = vector.broadcast %cst_70 : f32 to vector<16x128xf32>
    %119 = arith.maximumf %117, %118 : vector<16x128xf32>
    %c1_71 = arith.constant 1 : index
    %c0_72 = arith.constant 0 : index
    %c0_73 = arith.constant 0 : index
    %120 = vector.load %arg16[%c1_71, %c0_72, %c0_73] : memref<3x128x128xbf16, #tpu.memory_space<vmem>>, vector<1x128x128xbf16>
    %121 = vector.shape_cast %120 : vector<1x128x128xbf16> to vector<128x128xbf16>
    %c1_74 = arith.constant 1 : index
    %c0_75 = arith.constant 0 : index
    %c0_76 = arith.constant 0 : index
    %122 = vector.load %arg17[%c1_74, %c0_75, %c0_76] : memref<3x1x128xf32, #tpu.memory_space<vmem>>, vector<1x1x128xf32>
    %123 = vector.shape_cast %122 : vector<1x1x128xf32> to vector<1x128xf32>
    %124 = arith.truncf %119 : vector<16x128xf32> to vector<16x128xbf16>
    %cst_77 = arith.constant dense<0.000000e+00> : vector<16x128xf32>
    %125 = tpu.matmul %124, %121, %cst_77 {dimension_numbers = #tpu.dot_dimension_numbers<[1], [0], [0], [1], [0, 0, 1, 1], [], []>} : vector<16x128xbf16>, vector<128x128xbf16>, vector<16x128xf32> -> vector<16x128xf32>
    %126 = vector.broadcast %123 : vector<1x128xf32> to vector<16x128xf32>
    %127 = arith.addf %125, %126 : vector<16x128xf32>
    %cst_78 = arith.constant 0.000000e+00 : f32
    %128 = vector.broadcast %cst_78 : f32 to vector<16x128xf32>
    %129 = arith.maximumf %127, %128 : vector<16x128xf32>
    %c2 = arith.constant 2 : index
    %130 = memref.load %arg13[%c2] : memref<3xf32, #tpu.memory_space<smem>>
    %131 = arith.truncf %129 : vector<16x128xf32> to vector<16x128xbf16>
    %cst_79 = arith.constant dense<0.000000e+00> : vector<32x128xf32>
    %132 = tpu.matmul %34, %131, %cst_79 {dimension_numbers = #tpu.dot_dimension_numbers<[1], [0], [0], [1], [0, 0, 1, 1], [], []>} : vector<32x16xbf16>, vector<16x128xbf16>, vector<32x128xf32> -> vector<32x128xf32>
    %133 = arith.addf %132, %33 : vector<32x128xf32>
    %cst_80 = arith.constant 0.000000e+00 : f32
    %134 = vector.broadcast %cst_80 : f32 to vector<32x128xf32>
    %135 = arith.maximumf %133, %134 : vector<32x128xf32>
    %cst_81 = arith.constant 1.000000e-07 : f32
    %136 = vector.broadcast %cst_81 : f32 to vector<32x128xf32>
    %137 = arith.addf %135, %136 : vector<32x128xf32>
    %138 = vector.broadcast %130 : f32 to vector<32x128xf32>
    %139 = arith.mulf %138, %137 : vector<32x128xf32>
    %cst_82 = arith.constant dense<0xFF800000> : vector<128xf32>
    %140 = vector.multi_reduction <maximumf>, %139, %cst_82 [0] : vector<32x128xf32> to vector<128xf32>
    %141 = vector.shape_cast %140 : vector<128xf32> to vector<1x128xf32>
    %142 = vector.broadcast %141 : vector<1x128xf32> to vector<32x128xf32>
    %143 = arith.subf %139, %142 : vector<32x128xf32>
    %144 = math.exp %143 : vector<32x128xf32>
    %145 = arith.truncf %144 : vector<32x128xf32> to vector<32x128xbf16>
    %cst_83 = arith.constant dense<0.000000e+00> : vector<16x128xf32>
    %146 = tpu.matmul %35, %145, %cst_83 {dimension_numbers = #tpu.dot_dimension_numbers<[0], [0], [1], [1], [0, 1, 1, 1], [], []>} : vector<32x16xbf16>, vector<32x128xbf16>, vector<16x128xf32> -> vector<16x128xf32>
    %147 = arith.truncf %146 : vector<16x128xf32> to vector<16x128xbf16>
    %cst_84 = arith.constant dense<0.000000e+00> : vector<32x128xf32>
    %148 = tpu.matmul %35, %147, %cst_84 {dimension_numbers = #tpu.dot_dimension_numbers<[1], [0], [0], [1], [0, 0, 1, 1], [], []>} : vector<32x16xbf16>, vector<16x128xbf16>, vector<32x128xf32> -> vector<32x128xf32>
    %cst_85 = arith.constant 9.99999996E-13 : f32
    %149 = vector.broadcast %cst_85 : f32 to vector<32x128xf32>
    %150 = arith.maximumf %148, %149 : vector<32x128xf32>
    %151 = tpu.reciprocal %150 {approx = true} : vector<32x128xf32> -> vector<32x128xf32>
    %152 = arith.mulf %144, %151 : vector<32x128xf32>
    %153 = arith.mulf %152, %137 : vector<32x128xf32>
    %154 = arith.truncf %153 : vector<32x128xf32> to vector<32x128xbf16>
    %cst_86 = arith.constant dense<0.000000e+00> : vector<16x128xf32>
    %155 = tpu.matmul %35, %154, %cst_86 {dimension_numbers = #tpu.dot_dimension_numbers<[0], [0], [1], [1], [0, 1, 1, 1], [], []>} : vector<32x16xbf16>, vector<32x128xbf16>, vector<16x128xf32> -> vector<16x128xf32>
    %156 = arith.addf %155, %129 : vector<16x128xf32>
    %c2_87 = arith.constant 2 : index
    %c0_88 = arith.constant 0 : index
    %c0_89 = arith.constant 0 : index
    %157 = vector.load %arg14[%c2_87, %c0_88, %c0_89] : memref<3x128x128xbf16, #tpu.memory_space<vmem>>, vector<1x128x128xbf16>
    %158 = vector.shape_cast %157 : vector<1x128x128xbf16> to vector<128x128xbf16>
    %c2_90 = arith.constant 2 : index
    %c0_91 = arith.constant 0 : index
    %c0_92 = arith.constant 0 : index
    %159 = vector.load %arg15[%c2_90, %c0_91, %c0_92] : memref<3x1x128xf32, #tpu.memory_space<vmem>>, vector<1x1x128xf32>
    %160 = vector.shape_cast %159 : vector<1x1x128xf32> to vector<1x128xf32>
    %161 = arith.truncf %156 : vector<16x128xf32> to vector<16x128xbf16>
    %cst_93 = arith.constant dense<0.000000e+00> : vector<16x128xf32>
    %162 = tpu.matmul %161, %158, %cst_93 {dimension_numbers = #tpu.dot_dimension_numbers<[1], [0], [0], [1], [0, 0, 1, 1], [], []>} : vector<16x128xbf16>, vector<128x128xbf16>, vector<16x128xf32> -> vector<16x128xf32>
    %163 = vector.broadcast %160 : vector<1x128xf32> to vector<16x128xf32>
    %164 = arith.addf %162, %163 : vector<16x128xf32>
    %cst_94 = arith.constant 0.000000e+00 : f32
    %165 = vector.broadcast %cst_94 : f32 to vector<16x128xf32>
    %166 = arith.maximumf %164, %165 : vector<16x128xf32>
    %c2_95 = arith.constant 2 : index
    %c0_96 = arith.constant 0 : index
    %c0_97 = arith.constant 0 : index
    %167 = vector.load %arg16[%c2_95, %c0_96, %c0_97] : memref<3x128x128xbf16, #tpu.memory_space<vmem>>, vector<1x128x128xbf16>
    %168 = vector.shape_cast %167 : vector<1x128x128xbf16> to vector<128x128xbf16>
    %c2_98 = arith.constant 2 : index
    %c0_99 = arith.constant 0 : index
    %c0_100 = arith.constant 0 : index
    %169 = vector.load %arg17[%c2_98, %c0_99, %c0_100] : memref<3x1x128xf32, #tpu.memory_space<vmem>>, vector<1x1x128xf32>
    %170 = vector.shape_cast %169 : vector<1x1x128xf32> to vector<1x128xf32>
    %171 = arith.truncf %166 : vector<16x128xf32> to vector<16x128xbf16>
    %cst_101 = arith.constant dense<0.000000e+00> : vector<16x128xf32>
    %172 = tpu.matmul %171, %168, %cst_101 {dimension_numbers = #tpu.dot_dimension_numbers<[1], [0], [0], [1], [0, 0, 1, 1], [], []>} : vector<16x128xbf16>, vector<128x128xbf16>, vector<16x128xf32> -> vector<16x128xf32>
    %173 = vector.broadcast %170 : vector<1x128xf32> to vector<16x128xf32>
    %174 = arith.addf %172, %173 : vector<16x128xf32>
    %c0_102 = arith.constant 0 : index
    %c0_103 = arith.constant 0 : index
    %175 = vector.load %arg4[%c0_102, %c0_103] : memref<8x16xbf16, #tpu.memory_space<vmem>>, vector<8x16xbf16>
    %176 = arith.truncf %174 : vector<16x128xf32> to vector<16x128xbf16>
    %cst_104 = arith.constant dense<0.000000e+00> : vector<8x128xf32>
    %177 = tpu.matmul %175, %176, %cst_104 {dimension_numbers = #tpu.dot_dimension_numbers<[1], [0], [0], [1], [0, 0, 1, 1], [], []>} : vector<8x16xbf16>, vector<16x128xbf16>, vector<8x128xf32> -> vector<8x128xf32>
    %c0_105 = arith.constant 0 : index
    %c0_106 = arith.constant 0 : index
    %178 = vector.load %arg18[%c0_105, %c0_106] : memref<128x128xbf16, #tpu.memory_space<vmem>>, vector<128x128xbf16>
    %c0_107 = arith.constant 0 : index
    %c0_108 = arith.constant 0 : index
    %179 = vector.load %arg19[%c0_107, %c0_108] : memref<1x128xf32, #tpu.memory_space<vmem>>, vector<1x128xf32>
    %180 = arith.truncf %177 : vector<8x128xf32> to vector<8x128xbf16>
    %cst_109 = arith.constant dense<0.000000e+00> : vector<8x128xf32>
    %181 = tpu.matmul %180, %178, %cst_109 {dimension_numbers = #tpu.dot_dimension_numbers<[1], [0], [0], [1], [0, 0, 1, 1], [], []>} : vector<8x128xbf16>, vector<128x128xbf16>, vector<8x128xf32> -> vector<8x128xf32>
    %182 = vector.broadcast %179 : vector<1x128xf32> to vector<8x128xf32>
    %183 = arith.addf %181, %182 : vector<8x128xf32>
    %cst_110 = arith.constant 0.000000e+00 : f32
    %184 = vector.broadcast %cst_110 : f32 to vector<8x128xf32>
    %185 = arith.maximumf %183, %184 : vector<8x128xf32>
    %c0_111 = arith.constant 0 : index
    %c0_112 = arith.constant 0 : index
    %186 = vector.load %arg20[%c0_111, %c0_112] : memref<128x128xbf16, #tpu.memory_space<vmem>>, vector<128x128xbf16>
    %c0_113 = arith.constant 0 : index
    %c0_114 = arith.constant 0 : index
    %187 = vector.load %arg21[%c0_113, %c0_114] : memref<1x128xf32, #tpu.memory_space<vmem>>, vector<1x128xf32>
    %188 = arith.truncf %185 : vector<8x128xf32> to vector<8x128xbf16>
    %cst_115 = arith.constant dense<0.000000e+00> : vector<8x128xf32>
    %189 = tpu.matmul %188, %186, %cst_115 {dimension_numbers = #tpu.dot_dimension_numbers<[1], [0], [0], [1], [0, 0, 1, 1], [], []>} : vector<8x128xbf16>, vector<128x128xbf16>, vector<8x128xf32> -> vector<8x128xf32>
    %190 = vector.broadcast %187 : vector<1x128xf32> to vector<8x128xf32>
    %191 = arith.addf %189, %190 : vector<8x128xf32>
    %c0_116 = arith.constant 0 : index
    %c0_117 = arith.constant 0 : index
    %192 = vector.load %arg22[%c0_116, %c0_117] : memref<8x128xf32, #tpu.memory_space<vmem>>, vector<8x128xf32>
    tpu.vector_store %arg22[%c0_116, %c0_117], %191 {strides = array<i32>} : memref<8x128xf32, #tpu.memory_space<vmem>>, vector<8x128xf32>,
    return
  }
}

</mosaic_0001>

<bundles_post_ra>
// kernel: gen_forward.1
= control target key start
LH: loop header
LB: loop body
LE: loop exit
PB: predicated region body
PF: predicated region fallthrough
CT: control target
= control target key end

     0   :  { %s2887_s0 = inlined_call_operand.vmem [shape: f32[16,128], index: 0, kind: input, shape index: {}]   ;;  %s2888_s1 = inlined_call_operand.vmem [shape: f32[32,128], index: 1, kind: input, shape index: {}]   ;;  %s2889_s2 = inlined_call_operand.vmem [shape: bf16[32,16], index: 2, kind: input, shape index: {}]   ;;  %s2890_s3 = inlined_call_operand.vmem [shape: bf16[32,16], index: 3, kind: input, shape index: {}]   ;;  %s2891_s4 = inlined_call_operand.vmem [shape: bf16[8,16], index: 4, kind: input, shape index: {}]   ;;  %s2892_s5 = inlined_call_operand.vmem [shape: bf16[128,128], index: 5, kind: input, shape index: {}]   ;;  %s2893_s6 = inlined_call_operand.vmem [shape: f32[1,128], index: 6, kind: input, shape index: {}]   ;;  %s2894_s7 = inlined_call_operand.vmem [shape: bf16[128,128], index: 7, kind: input, shape index: {}]   ;;  %s2895_s8 = inlined_call_operand.vmem [shape: f32[1,128], index: 8, kind: input, shape index: {}]   ;;  %s2896_s9 = inlined_call_operand.vmem [shape: bf16[128,128], index: 9, kind: input, shape index: {}]   ;;  %s2897_s10 = inlined_call_operand.vmem [shape: f32[1,128], index: 10, kind: input, shape index: {}]   ;;  %s2898_s11 = inlined_call_operand.vmem [shape: bf16[128,128], index: 11, kind: input, shape index: {}]   ;;  %s2899_s12 = inlined_call_operand.vmem [shape: f32[1,128], index: 12, kind: input, shape index: {}]   ;;  %s2900_s13 = inlined_call_operand.vmem [shape: f32[3], index: 13, kind: input, shape index: {}]   ;;  %s2901_s14 = inlined_call_operand.vmem [shape: bf16[3,128,128], index: 14, kind: input, shape index: {}]   ;;  %s2902_s15 = inlined_call_operand.vmem [shape: f32[3,1,128], index: 15, kind: input, shape index: {}]   ;;  %s2903_s16 = inlined_call_operand.vmem [shape: bf16[3,128,128], index: 16, kind: input, shape index: {}]   ;;  %s2904_s17 = inlined_call_operand.vmem [shape: f32[3,1,128], index: 17, kind: input, shape index: {}]   ;;  %s2905_s18 = inlined_call_operand.vmem [shape: bf16[128,128], index: 18, kind: input, shape index: {}]   ;;  %s2906_s19 = inlined_call_operand.vmem [shape: f32[1,128], index: 19, kind: input, shape index: {}]   ;;  %s2907_s20 = inlined_call_operand.vmem [shape: bf16[128,128], index: 20, kind: input, shape index: {}]   ;;  %s2908_s21 = inlined_call_operand.vmem [shape: f32[1,128], index: 21, kind: input, shape index: {}]   ;;  %s2909_s22 = inlined_call_operand.vmem [shape: f32[8,128], index: 22, kind: output, shape index: {}]  }
   0x1   :  { %2915 = sst [smem:[#allocation5_spill]] %s2887_s0 }
   0x2   :  { %2916 = sst [smem:[#allocation6_spill]] %s2888_s1 }
   0x3   :  { %2917 = sst [smem:[#allocation7_spill]] %s2889_s2 }
   0x4   :  { %2918 = sst [smem:[#allocation8_spill]] %s2890_s3 }
   0x5   :  { %2919 = sst [smem:[#allocation9_spill]] %s2891_s4 }
   0x6   :  { %2920 = sst [smem:[#allocation10_spill]] %s2892_s5 }
   0x7   :  { %2921 = sst [smem:[#allocation11_spill]] %s2893_s6 }
   0x8   :  { %27 = vsyncpa [#allocation3], 0  ;;  %s59_s29 = sshll.u32 %s2900_s13, 4  ;;  %s2249_s30 = smov [#allocation2]   ;;  %s60_s29 = int_to_ptr.vmem [resolvable:$true] %s59_s29 }
   0x9   :  { %62 = dma.vmem_to_smem %s60_s29, 16, %s2249_s30, [#allocation3]  }
   0xa   :  { %2247 = dma.done.wait [#allocation3], 16  }
   0xb   :  { %2248 = vsyncadd [#allocation3], 4294967280 }
   0xc   :  { %83 = sfence }
   0xd   :  { %s2922_s23 = sld [smem:[#allocation10_spill]]  ;;  %v2096_v2 = vld [vmem:[%s2896_s9 + $0x38] sm:$0xff]  ;;  %v2095_v3 = vld [vmem:[%s2896_s9 + $0x30] sm:$0xff]  ;;  %v2094_v6 = vld [vmem:[%s2896_s9 + $0x28] sm:$0xff]  ;;  %vm467_vm0 = vcmask 130048   ;;  %vm557_vm1 = vcmask 261120  }
   0xe   :  { %331 = vmatpush.bf16.msra.mxu2 %v2096_v2  ;;  %v2088_v5 = vld [vmem:[%s2894_s7 + $0x38] sm:$0xff]  ;;  %v2087_v8 = vld [vmem:[%s2894_s7 + $0x30] sm:$0xff]  ;;  %v2086_v9 = vld [vmem:[%s2894_s7 + $0x28] sm:$0xff]  ;;  %s2923_s27 = sld [smem:[#allocation5_spill]] }
   0xf   :  { %241 = vmatpush.bf16.msra.mxu1 %v2088_v5  ;;  %v2093_v10 = vld [vmem:[%s2896_s9 + $0x20] sm:$0xff]  ;;  %v2092_v13 = vld [vmem:[%s2896_s9 + $0x18] sm:$0xff]  ;;  %v2091_v15 = vld [vmem:[%s2896_s9 + $0x10] sm:$0xff]  ;;  %s2924_s1 = sld [smem:[#allocation6_spill]] }
  0x10   :  { %v2085_v12 = vld [vmem:[%s2894_s7 + $0x20] sm:$0xff]  ;;  %v2090_v17 = vld [vmem:[%s2896_s9 + $0x8] sm:$0xff]  ;;  %v2084_v26 = vld [vmem:[%s2894_s7 + $0x18] sm:$0xff]  ;;  %s2925_s3 = sld [smem:[#allocation11_spill]] }
  0x11   :  { %v2089_v22 = vld [vmem:[%s2896_s9] sm:$0xff]  ;;  %v2083_v30 = vld [vmem:[%s2894_s7 + $0x10] sm:$0xff]  ;;  %v2082_v31 = vld [vmem:[%s2894_s7 + $0x8] sm:$0xff]  ;;  %s2926_s5 = sld [smem:[#allocation8_spill]] }
  0x12   :  { %332 = vmatpush.bf16.msra.mxu2 %v2095_v3  ;;  %v2081_v32 = vld [vmem:[%s2894_s7] sm:$0xff]  ;;  %v2104_v33 = vld [vmem:[%s2898_s11 + $0x38] sm:$0xff]  ;;  %v2103_v34 = vld [vmem:[%s2898_s11 + $0x30] sm:$0xff]  ;;  %s2927_s7 = sld [smem:[#allocation7_spill]] }
  0x13   :  { %v2080_v0 = vld [vmem:[%s2922_s23 + $0x38] sm:$0xff]  ;;  %v2079_v1 = vld [vmem:[%s2922_s23 + $0x30] sm:$0xff]  ;;  %v2078_v4 = vld [vmem:[%s2922_s23 + $0x28] sm:$0xff]  ;;  %242 = vmatpush.bf16.msra.mxu1 %v2087_v8  ;;  %424 = vmatpush.bf16.msra.mxu3 %v2104_v33  ;;  %s2928_s6 = sld [smem:[#allocation9_spill]] }
  0x14   :  { %156 = vmatpush.bf16.msra.mxu0 %v2080_v0  ;;  %v2077_v7 = vld [vmem:[%s2922_s23 + $0x20] sm:$0xff]  ;;  %v2076_v11 = vld [vmem:[%s2922_s23 + $0x18] sm:$0xff]  ;;  %v2075_v14 = vld [vmem:[%s2922_s23 + $0x10] sm:$0xff] }
  0x15   :  { %v2074_v16 = vld [vmem:[%s2922_s23 + $0x8] sm:$0xff]  ;;  %v2073_v18 = vld [vmem:[%s2922_s23] sm:$0xff]  ;;  %v259_v27 = vld [vmem:[%s2924_s1 + $0x10] sm:$0xff] }
  0x16   :  { %333 = vmatpush.bf16.msra.mxu2 %v2094_v6  ;;  %v85_v19 = vld [vmem:[%s2923_s27] sm:$0xff]  ;;  %v86_v20 = vld [vmem:[%s2923_s27 + $0x8] sm:$0xff]  ;;  %v260_v28 = vld [vmem:[%s2924_s1 + $0x18] sm:$0xff] }
  0x17   :  { %243 = vmatpush.bf16.msra.mxu1 %v2086_v9  ;;  %v104_v21 = vpack.c.bf16 %v86_v20, %v85_v19  ;;  %v257_v23 = vld [vmem:[%s2924_s1] sm:$0xff]  ;;  %v258_v24 = vld [vmem:[%s2924_s1 + $0x8] sm:$0xff]  ;;  %v279_v29 = vpack.c.bf16 %v260_v28, %v259_v27  ;;  %425 = vmatpush.bf16.msra.mxu3 %v2103_v34  ;;  %v2100_v37 = vld [vmem:[%s2898_s11 + $0x18] sm:$0xff] }
  0x18   :  { %157 = vmatpush.bf16.msra.mxu0 %v2079_v1  ;;  %v278_v25 = vpack.c.bf16 %v258_v24, %v257_v23  ;;  %v2102_v35 = vld [vmem:[%s2898_s11 + $0x28] sm:$0xff]  ;;  %v2101_v36 = vld [vmem:[%s2898_s11 + $0x20] sm:$0xff]  ;;  %v2099_v39 = vld [vmem:[%s2898_s11 + $0x10] sm:$0xff] }
  0x19   :  { %v2175_v40 = vld [vmem:[%s2925_s3] ss:$0 sm:$0xff]  ;;  %v2098_v41 = vld [vmem:[%s2898_s11 + $0x8] sm:$0xff] }
  0x1a   :  { %334 = vmatpush.bf16.msra.mxu2 %v2093_v10  ;;  %v2097_v46 = vld [vmem:[%s2898_s11] sm:$0xff]  ;;  %v2515_v10 = vld [vmem:[%s2926_s5 + $0x8] sm:$0xff] }
  0x1b   :  { %244 = vmatpush.bf16.msra.mxu1 %v2085_v12  ;;  %426 = vmatpush.bf16.msra.mxu3 %v2102_v35  ;;  %v2176_v47 = vld [vmem:[%s2897_s10] ss:$0 sm:$0xff]  ;;  %s1903_s10 = sld [smem:[#allocation2 + $0x2]] }
  0x1c   :  { %158 = vmatpush.bf16.msra.mxu0 %v2078_v4  ;;  %v2491_v1 = vld [vmem:[%s2926_s5] sm:$0xff] }
  0x1d   :  { %v2177_v2 = vld [vmem:[%s2895_s8] ss:$0 sm:$0xff]  ;;  %541 = vxpose.xlu0.c.b16.start [1/2] (short) (narrow) %v2491_v1, 16 }
  0x1e   :  { %335 = vmatpush.bf16.msra.mxu2 %v2092_v13  ;;  %v2510_v9 = vld [vmem:[%s2927_s7] sm:$0xff] }
  0x1f   :  { %245 = vmatpush.bf16.msra.mxu1 %v2084_v26  ;;  %427 = vmatpush.bf16.msra.mxu3 %v2101_v36 }
  0x20   :  { %159 = vmatpush.bf16.msra.mxu0 %v2077_v7 }
  0x22   :  { %336 = vmatpush.bf16.msra.mxu2 %v2091_v15 }
  0x23   :  { %246 = vmatpush.bf16.msra.mxu1 %v2083_v30  ;;  %428 = vmatpush.bf16.msra.mxu3 %v2100_v37 }
  0x24   :  { %160 = vmatpush.bf16.msra.mxu0 %v2076_v11  ;;  %v2523_v11 = vld [vmem:[%s2927_s7 + $0x8] sm:$0xff]  ;;  %s1798_s7 = sld [smem:[#allocation2 + $0x1]] }
  0x26   :  { %337 = vmatpush.bf16.msra.mxu2 %v2090_v17 }
  0x27   :  { %247 = vmatpush.bf16.msra.mxu1 %v2082_v31  ;;  %429 = vmatpush.bf16.msra.mxu3 %v2099_v39 }
  0x28   :  { %161 = vmatpush.bf16.msra.mxu0 %v2075_v14 }
  0x2a   :  { %338 = vmatpush.bf16.msra.mxu2 %v2089_v22 }
  0x2b   :  { %248 = vmatpush.bf16.msra.mxu1 %v2081_v32  ;;  %430 = vmatpush.bf16.msra.mxu3 %v2098_v41 }
  0x2c   :  { %162 = vmatpush.bf16.msra.mxu0 %v2074_v16  ;;  %v2178_v16 = vld [vmem:[%s2899_s12] ss:$0 sm:$0xff]  ;;  %s455_s12 = sld [smem:[#allocation2]] }
  0x2d   :  { %339 = vmatmul.bf16.vlgmr.msra.gmra.mxu2 %v278_v25  ;;  %542 = vxpose.xlu0.c.b16.end [2/2] (short) (narrow) %v2515_v10, 16 }
  0x2f   :  { %431 = vmatpush.bf16.msra.mxu3 %v2097_v46 }
  0x30   :  { %163 = vmatpush.bf16.msra.mxu0 %v2073_v18 }
  0x33   :  { %164 = vmatmul.bf16.vlgmr.msra.gmra.mxu0 %v104_v21 }
  0x3d   :  { %344 = vmatmul.bf16.gmra.mxu2 %v279_v29 }
  0xb0   :  { %v165_v38 = vpop.f32.mrf.mxu0  ;;  %v340_v45 = vpop.f32.mrf.mxu2 }
  0xb1   :  { %v166_v42 = vadd.f32 %v2175_v40, %v165_v38  ;;  %v341_v51 = vadd.f32 %v2176_v47, %v340_v45 }
  0xb3   :  { %v170_v48 = vmax.f32 %v166_v42, 0.0  ;;  %v350_v53 = vmax.f32 %v341_v51, 0.0 }
  0xb8   :  { %v167_v43 = vpop.f32.mrf.mxu0  ;;  %v342_v52 = vpop.f32.mrf.mxu2 }
  0xb9   :  { %v168_v44 = vadd.f32 %v2175_v40, %v167_v43  ;;  %v343_v54 = vadd.f32 %v2176_v47, %v342_v52  ;;  %v501_v40 = vstv %s455_s12 }
  0xbb   :  { %v171_v49 = vmax.f32 %v168_v44, 0.0  ;;  %v351_v55 = vmax.f32 %v343_v54, 0.0 }
  0xbd   :  { %v189_v50 = vpack.c.bf16 %v171_v49, %v170_v48  ;;  %v371_v56 = vpack.c.bf16 %v351_v55, %v350_v53 }
  0xbf   :  { %249 = vmatmul.bf16.vlgmr.msra.gmra.mxu1 %v189_v50  ;;  %432 = vmatmul.bf16.vlgmr.msra.gmra.mxu3 %v371_v56 }
  0xc0   :  { %v345_v57 = vpop.f32.mrf.mxu2 }
  0xc1   :  { %v346_v58 = vadd.f32 %v2176_v47, %v345_v57 }
  0xc3   :  { %v352_v60 = vmax.f32 %v346_v58, 0.0 }
  0xc8   :  { %v347_v59 = vpop.f32.mrf.mxu2 }
  0xc9   :  { %v348_v61 = vadd.f32 %v2176_v47, %v347_v59 }
  0xcb   :  { %v353_v62 = vmax.f32 %v348_v61, 0.0 }
  0xcd   :  { %v372_v63 = vpack.c.bf16 %v353_v62, %v352_v60 }
  0xcf   :  { %437 = vmatmul.bf16.gmra.mxu3 %v372_v63 }
 0x13c   :  { %v250_v0 = vpop.f32.mrf.mxu1 }
 0x13d   :  { %v2497_v3 = vadd.f32 %v2177_v2, %v250_v0 }
 0x13f   :  { %v255_v6 = vmax.f32 %v2497_v3, 0.0  ;;  %v2118_v3 = vld [vmem:[%s2903_s16 + $0x8] sm:$0xff] }
 0x142   :  { %v433_v12 = vpop.f32.mrf.mxu3 }
 0x143   :  { %v434_v19 = vadd.f32 %v2178_v16, %v433_v12 }
 0x144   :  { %v252_v4 = vpop.f32.mrf.mxu1 }
 0x145   :  { %v2499_v5 = vadd.f32 %v2177_v2, %v252_v4  ;;  %v2532_v24 = vmax.f32 %v434_v19, 0.0  ;;  %v2116_v19 = vld [vmem:[%s2901_s14 + $0x38] sm:$0xff] }
 0x146   :  { %702 = vmatpush.bf16.msrb.mxu3 %v2116_v19 }
 0x147   :  { %v256_v7 = vmax.f32 %v2499_v5, 0.0  ;;  %v2117_v5 = vld [vmem:[%s2903_s16] sm:$0xff] }
 0x149   :  { %v456_v8 = vpack.c.bf16 %v256_v7, %v255_v6 }
 0x14a   :  { %v435_v13 = vpop.f32.mrf.mxu3 }
 0x14b   :  { %481 = vmatpush.bf16.msrb.mxu0 %v456_v8  ;;  %v436_v18 = vadd.f32 %v2178_v16, %v435_v13  ;;  %v2554_v13 = vpop.trf.xlu0 }
 0x14d   :  { %v2530_v21 = vmax.f32 %v436_v18, 0.0 }
 0x14e   :  { %1720 = vmatmul.msk.bf16.vlgmr.msrb.gmra.mxu0 %vm467_vm0, %v2510_v9 }
 0x152   :  { %v438_v15 = vpop.f32.mrf.mxu3 }
 0x153   :  { %v439_v20 = vadd.f32 %v2178_v16, %v438_v15 }
 0x155   :  { %v2534_v25 = vmax.f32 %v439_v20, 0.0 }
 0x15a   :  { %v440_v22 = vpop.f32.mrf.mxu3 }
 0x15b   :  { %v441_v28 = vadd.f32 %v2178_v16, %v440_v22  ;;  %v2115_v22 = vld [vmem:[%s2901_s14 + $0x30] sm:$0xff] }
 0x15c   :  { %703 = vmatpush.bf16.msrb.mxu3 %v2115_v22 }
 0x15d   :  { %v2539_v32 = vmax.f32 %v441_v28, 0.0 }
 0x15e   :  { %1721 = vmatmul.msk.bf16.gmra.mxu0 %vm467_vm0, %v2523_v11 }
 0x1cb   :  { %v483_v14 = vpop.f32.mrf.mxu0 }
 0x1cc   :  { %v484_v27 = vadd.f32 %v483_v14, %v2532_v24 }
 0x1ce   :  { %v493_v31 = vmax.f32 %v484_v27, 0.0  ;;  %v2114_v27 = vld [vmem:[%s2901_s14 + $0x28] sm:$0xff] }
 0x1cf   :  { %704 = vmatpush.bf16.msrb.mxu3 %v2114_v27 }
 0x1d0   :  { %v2544_v37 = vadd.f32 1e-07, %v493_v31  ;;  %v2113_v31 = vld [vmem:[%s2901_s14 + $0x20] sm:$0xff] }
 0x1d2   :  { %v502_v43 = vmul.f32 %v501_v40, %v2544_v37 }
 0x1d3   :  { %v485_v17 = vpop.f32.mrf.mxu0  ;;  %705 = vmatpush.bf16.msrb.mxu3 %v2113_v31 }
 0x1d4   :  { %v486_v26 = vadd.f32 %v485_v17, %v2530_v21 }
 0x1d6   :  { %v494_v30 = vmax.f32 %v486_v26, 0.0 }
 0x1d8   :  { %v2541_v35 = vadd.f32 1e-07, %v494_v30 }
 0x1da   :  { %v503_v41 = vmul.f32 %v501_v40, %v2541_v35 }
 0x1db   :  { %v488_v23 = vpop.f32.mrf.mxu0 }
 0x1dc   :  { %v489_v29 = vadd.f32 %v488_v23, %v2534_v25  ;;  %v506_v46 = vmax.f32 %v502_v43, %v503_v41 }
 0x1de   :  { %v495_v33 = vmax.f32 %v489_v29, 0.0 }
 0x1e0   :  { %v2546_v38 = vadd.f32 1e-07, %v495_v33 }
 0x1e2   :  { %v504_v44 = vmul.f32 %v501_v40, %v2546_v38 }
 0x1e3   :  { %v490_v34 = vpop.f32.mrf.mxu0 }
 0x1e4   :  { %v491_v36 = vadd.f32 %v490_v34, %v2539_v32  ;;  %v2112_v34 = vld [vmem:[%s2901_s14 + $0x18] sm:$0xff] }
 0x1e5   :  { %706 = vmatpush.bf16.msrb.mxu3 %v2112_v34 }
 0x1e6   :  { %v496_v39 = vmax.f32 %v491_v36, 0.0 }
 0x1e8   :  { %v2549_v42 = vadd.f32 1e-07, %v496_v39 }
 0x1ea   :  { %v505_v45 = vmul.f32 %v501_v40, %v2549_v42 }
 0x1ec   :  { %v507_v47 = vmax.f32 %v504_v44, %v505_v45 }
 0x1ee   :  { %v508_v48 = vmax.f32 %v506_v46, %v507_v47 }
 0x1f0   :  { %v509_v49 = vrot.slane %v508_v48, 4 }
 0x1f2   :  { %v510_v50 = vmax.f32 %v508_v48, %v509_v49 }
 0x1f4   :  { %v511_v51 = vrot.slane %v510_v50, 2 }
 0x1f6   :  { %v512_v52 = vmax.f32 %v510_v50, %v511_v51 }
 0x1f8   :  { %v513_v53 = vrot.slane %v512_v52, 1 }
 0x1fa   :  { %v514_v54 = vmax.f32 %v512_v52, %v513_v53  ;;  %v2111_v52 = vld [vmem:[%s2901_s14 + $0x10] sm:$0xff]  ;;  %v2122_v53 = vld [vmem:[%s2903_s16 + $0x28] sm:$0xff] }
 0x1fb   :  { %707 = vmatpush.bf16.msrb.mxu3 %v2111_v52 }
 0x1fc   :  { %v518_v55 = vsub.f32 %v505_v45, %v514_v54  ;;  %v517_v56 = vsub.f32 %v504_v44, %v514_v54  ;;  %v515_v57 = vsub.f32 %v502_v43, %v514_v54  ;;  %v516_v58 = vsub.f32 %v503_v41, %v514_v54  ;;  %v2121_v54 = vld [vmem:[%s2903_s16 + $0x20] sm:$0xff] }
 0x1fe   :  { %v525_v59 = vmul.f32 1.442695, %v518_v55  ;;  %v523_v60 = vmul.f32 1.442695, %v517_v56  ;;  %v519_v61 = vmul.f32 1.442695, %v515_v57 }
 0x1ff   :  { %v521_v62 = vmul.f32 1.442695, %v516_v58 }
 0x200   :  { %2187 = vpow2.f32 %v525_v59 }
 0x201   :  { %2189 = vpow2.f32 %v523_v60  ;;  %v2120_v60 = vld [vmem:[%s2903_s16 + $0x18] sm:$0xff] }
 0x202   :  { %2191 = vpow2.f32 %v519_v61  ;;  %v2119_v61 = vld [vmem:[%s2903_s16 + $0x10] sm:$0xff] }
 0x203   :  { %2193 = vpow2.f32 %v521_v62 }
 0x206   :  { %v2188_v63 = vpop.eup %2187 }
 0x207   :  { %v2190_v0 = vpop.eup %2189 }
 0x208   :  { %v2192_v2 = vpop.eup %2191  ;;  %v528_v4 = vpack.c.bf16 %v2188_v63, %v2190_v0 }
 0x209   :  { %v2194_v8 = vpop.eup %2193 }
 0x20a   :  { %567 = vmatpush.bf16.msrb.mxu1 %v528_v4  ;;  %v527_v12 = vpack.c.bf16 %v2194_v8, %v2192_v2 }
 0x20e   :  { %568 = vmatpush.bf16.msrb.mxu1 %v527_v12 }
 0x211   :  { %1730 = vmatmul.msk.bf16.vlgmr.msrb.gmra.mxu1 %vm557_vm1, %v2554_v13 }
 0x28e   :  { %v570_v14 = vpop.f32.mrf.mxu1 }
 0x296   :  { %v572_v15 = vpop.f32.mrf.mxu1 }
 0x297   :  { %v575_v16 = vpack.c.bf16 %v572_v15, %v570_v14  ;;  %v2180_v14 = vld [vmem:[%s2904_s17] ss:$0 sm:$0xff] }
 0x299   :  { %589 = vmatpush.bf16.msra.mxu1 %v575_v16 }
 0x29c   :  { %1731 = vmatmul.msk.bf16.vlgmr.msra.gmra.mxu1 %vm467_vm0, %v2491_v1 }
 0x2ac   :  { %1732 = vmatmul.msk.bf16.gmra.mxu1 %vm467_vm0, %v2515_v10 }
 0x319   :  { %v591_v17 = vpop.f32.mrf.mxu1 }
 0x31a   :  { %v601_v28 = vmax.f32 %v591_v17, 1e-12 }
 0x321   :  { %v593_v18 = vpop.f32.mrf.mxu1 }
 0x322   :  { %v602_v26 = vmax.f32 %v593_v18, 1e-12 }
 0x329   :  { %v596_v20 = vpop.f32.mrf.mxu1 }
 0x32a   :  { %v603_v23 = vmax.f32 %v596_v20, 1e-12 }
 0x32c   :  { %2195 = vrcp.f32 %v603_v23 }
 0x32d   :  { %2197 = vrcp.f32 %v602_v26 }
 0x32e   :  { %2199 = vrcp.f32 %v601_v28 }
 0x331   :  { %v598_v29 = vpop.f32.mrf.mxu1 }
 0x332   :  { %v604_v30 = vmax.f32 %v598_v29, 1e-12  ;;  %v2196_v33 = vpop.eup %2195 }
 0x333   :  { %v2198_v36 = vpop.eup %2197  ;;  %v611_v40 = vmul.f32 %v2196_v33, %v2190_v0 }
 0x334   :  { %2201 = vrcp.f32 %v604_v30  ;;  %v2200_v39 = vpop.eup %2199  ;;  %v610_v44 = vmul.f32 %v2198_v36, %v2194_v8 }
 0x335   :  { %v615_v45 = vmul.f32 %v611_v40, %v2546_v38  ;;  %v609_v47 = vmul.f32 %v2200_v39, %v2192_v2  ;;  %v2110_v38 = vld [vmem:[%s2901_s14 + $0x8] sm:$0xff] }
 0x336   :  { %v614_v49 = vmul.f32 %v610_v44, %v2541_v35  ;;  %708 = vmatpush.bf16.msrb.mxu3 %v2110_v38  ;;  %v2109_v35 = vld [vmem:[%s2901_s14] sm:$0xff]  ;;  %v832_v44 = vstv %s1798_s7 }
 0x337   :  { %v613_v50 = vmul.f32 %v609_v47, %v2544_v37  ;;  %v2124_v37 = vld [vmem:[%s2903_s16 + $0x38] sm:$0xff] }
 0x338   :  { %787 = vmatpush.bf16.msra.mxu0 %v2124_v37 }
 0x339   :  { %v617_v51 = vpack.c.bf16 %v614_v49, %v613_v50 }
 0x33a   :  { %v2202_v41 = vpop.eup %2201  ;;  %709 = vmatpush.bf16.msrb.mxu3 %v2109_v35 }
 0x33b   :  { %v612_v43 = vmul.f32 %v2202_v41, %v2188_v63 }
 0x33d   :  { %v616_v46 = vmul.f32 %v612_v43, %v2549_v42  ;;  %v2123_v42 = vld [vmem:[%s2903_s16 + $0x30] sm:$0xff] }
 0x33e   :  { %788 = vmatpush.bf16.msra.mxu0 %v2123_v42 }
 0x33f   :  { %v618_v48 = vpack.c.bf16 %v616_v46, %v615_v45 }
 0x341   :  { %625 = vmatpush.bf16.msrb.mxu2 %v618_v48 }
 0x342   :  { %789 = vmatpush.bf16.msra.mxu0 %v2122_v53 }
 0x345   :  { %626 = vmatpush.bf16.msrb.mxu2 %v617_v51 }
 0x346   :  { %790 = vmatpush.bf16.msra.mxu0 %v2121_v54 }
 0x348   :  { %1733 = vmatmul.msk.bf16.vlgmr.msrb.gmra.mxu2 %vm557_vm1, %v2554_v13 }
 0x34a   :  { %791 = vmatpush.bf16.msra.mxu0 %v2120_v60 }
 0x34e   :  { %792 = vmatpush.bf16.msra.mxu0 %v2119_v61 }
 0x352   :  { %793 = vmatpush.bf16.msra.mxu0 %v2118_v3 }
 0x356   :  { %794 = vmatpush.bf16.msra.mxu0 %v2117_v5 }
 0x3cb   :  { %v628_v55 = vpop.f32.mrf.mxu2 }
 0x3cc   :  { %v629_v57 = vadd.f32 %v628_v55, %v255_v6 }
 0x3d3   :  { %v630_v56 = vpop.f32.mrf.mxu2 }
 0x3d4   :  { %v631_v58 = vadd.f32 %v630_v56, %v256_v7  ;;  %v2179_v7 = vld [vmem:[%s2902_s15] ss:$0 sm:$0xff] }
 0x3d6   :  { %v650_v59 = vpack.c.bf16 %v631_v58, %v629_v57 }
 0x3d8   :  { %710 = vmatmul.bf16.vlgmr.msrb.gmra.mxu3 %v650_v59 }
 0x45b   :  { %v711_v6 = vpop.f32.mrf.mxu3 }
 0x45c   :  { %v712_v62 = vadd.f32 %v2179_v7, %v711_v6 }
 0x45e   :  { %v716_v2 = vmax.f32 %v712_v62, 0.0 }
 0x463   :  { %v713_v63 = vpop.f32.mrf.mxu3 }
 0x464   :  { %v714_v0 = vadd.f32 %v2179_v7, %v713_v63 }
 0x466   :  { %v717_v4 = vmax.f32 %v714_v0, 0.0 }
 0x468   :  { %v735_v8 = vpack.c.bf16 %v717_v4, %v716_v2 }
 0x46a   :  { %795 = vmatmul.bf16.vlgmr.msra.gmra.mxu0 %v735_v8 }
 0x4e7   :  { %v796_v12 = vpop.f32.mrf.mxu0 }
 0x4e8   :  { %v2626_v15 = vadd.f32 %v2180_v14, %v796_v12 }
 0x4ea   :  { %v801_v18 = vmax.f32 %v2626_v15, 0.0  ;;  %v2134_v15 = vld [vmem:[%s2903_s16 + $0x48] sm:$0xff] }
 0x4ef   :  { %v798_v16 = vpop.f32.mrf.mxu0 }
 0x4f0   :  { %v2628_v17 = vadd.f32 %v2180_v14, %v798_v16  ;;  %v2132_v16 = vld [vmem:[%s2901_s14 + $0x78] sm:$0xff] }
 0x4f2   :  { %v802_v19 = vmax.f32 %v2628_v17, 0.0  ;;  %v2133_v17 = vld [vmem:[%s2903_s16 + $0x40] sm:$0xff] }
 0x4f4   :  { %v804_v20 = vpack.c.bf16 %v802_v19, %v801_v18 }
 0x4f6   :  { %812 = vmatpush.bf16.msra.mxu2 %v804_v20 }
 0x4f9   :  { %1799 = vmatmul.msk.bf16.vlgmr.msra.gmra.mxu2 %vm467_vm0, %v2510_v9 }
 0x4fa   :  { %997 = vmatpush.bf16.msrb.mxu2 %v2132_v16 }
 0x509   :  { %1800 = vmatmul.msk.bf16.gmra.mxu2 %vm467_vm0, %v2523_v11 }
 0x57c   :  { %v814_v22 = vpop.f32.mrf.mxu2 }
 0x57d   :  { %v815_v28 = vadd.f32 %v814_v22, %v2532_v24  ;;  %v2131_v22 = vld [vmem:[%s2901_s14 + $0x70] sm:$0xff] }
 0x57e   :  { %998 = vmatpush.bf16.msrb.mxu2 %v2131_v22 }
 0x57f   :  { %v824_v31 = vmax.f32 %v815_v28, 0.0 }
 0x581   :  { %v2646_v40 = vadd.f32 1e-07, %v824_v31  ;;  %v2129_v31 = vld [vmem:[%s2901_s14 + $0x60] sm:$0xff] }
 0x583   :  { %v833_v47 = vmul.f32 %v832_v44, %v2646_v40 }
 0x584   :  { %v816_v23 = vpop.f32.mrf.mxu2 }
 0x585   :  { %v817_v27 = vadd.f32 %v816_v23, %v2530_v21 }
 0x587   :  { %v825_v30 = vmax.f32 %v817_v27, 0.0  ;;  %v2130_v27 = vld [vmem:[%s2901_s14 + $0x68] sm:$0xff] }
 0x588   :  { %999 = vmatpush.bf16.msrb.mxu2 %v2130_v27 }
 0x589   :  { %v2643_v36 = vadd.f32 1e-07, %v825_v30 }
 0x58b   :  { %v834_v45 = vmul.f32 %v832_v44, %v2643_v36 }
 0x58c   :  { %v819_v26 = vpop.f32.mrf.mxu2  ;;  %1000 = vmatpush.bf16.msrb.mxu2 %v2129_v31 }
 0x58d   :  { %v820_v29 = vadd.f32 %v819_v26, %v2534_v25  ;;  %v837_v50 = vmax.f32 %v833_v47, %v834_v45 }
 0x58f   :  { %v826_v33 = vmax.f32 %v820_v29, 0.0 }
 0x591   :  { %v2648_v41 = vadd.f32 1e-07, %v826_v33 }
 0x593   :  { %v835_v48 = vmul.f32 %v832_v44, %v2648_v41 }
 0x594   :  { %v821_v34 = vpop.f32.mrf.mxu2 }
 0x595   :  { %v822_v39 = vadd.f32 %v821_v34, %v2539_v32  ;;  %v2128_v34 = vld [vmem:[%s2901_s14 + $0x58] sm:$0xff] }
 0x596   :  { %1001 = vmatpush.bf16.msrb.mxu2 %v2128_v34 }
 0x597   :  { %v827_v43 = vmax.f32 %v822_v39, 0.0 }
 0x599   :  { %v2651_v46 = vadd.f32 1e-07, %v827_v43 }
 0x59b   :  { %v836_v49 = vmul.f32 %v832_v44, %v2651_v46 }
 0x59d   :  { %v838_v51 = vmax.f32 %v835_v48, %v836_v49 }
 0x59f   :  { %v839_v52 = vmax.f32 %v837_v50, %v838_v51 }
 0x5a1   :  { %v840_v38 = vrot.slane %v839_v52, 4 }
 0x5a3   :  { %v841_v35 = vmax.f32 %v839_v52, %v840_v38 }
 0x5a5   :  { %v842_v37 = vrot.slane %v841_v35, 2 }
 0x5a7   :  { %v843_v42 = vmax.f32 %v841_v35, %v842_v37 }
 0x5a9   :  { %v844_v53 = vrot.slane %v843_v42, 1 }
 0x5ab   :  { %v845_v54 = vmax.f32 %v843_v42, %v844_v53  ;;  %v2127_v42 = vld [vmem:[%s2901_s14 + $0x50] sm:$0xff]  ;;  %v2138_v53 = vld [vmem:[%s2903_s16 + $0x68] sm:$0xff] }
 0x5ac   :  { %1002 = vmatpush.bf16.msrb.mxu2 %v2127_v42 }
 0x5ad   :  { %v849_v55 = vsub.f32 %v836_v49, %v845_v54  ;;  %v848_v56 = vsub.f32 %v835_v48, %v845_v54  ;;  %v846_v57 = vsub.f32 %v833_v47, %v845_v54  ;;  %v847_v58 = vsub.f32 %v834_v45, %v845_v54  ;;  %v2137_v54 = vld [vmem:[%s2903_s16 + $0x60] sm:$0xff] }
 0x5af   :  { %v856_v59 = vmul.f32 1.442695, %v849_v55  ;;  %v854_v60 = vmul.f32 1.442695, %v848_v56  ;;  %v850_v61 = vmul.f32 1.442695, %v846_v57 }
 0x5b0   :  { %v852_v3 = vmul.f32 1.442695, %v847_v58 }
 0x5b1   :  { %2203 = vpow2.f32 %v856_v59 }
 0x5b2   :  { %2205 = vpow2.f32 %v854_v60  ;;  %v2136_v60 = vld [vmem:[%s2903_s16 + $0x58] sm:$0xff] }
 0x5b3   :  { %2207 = vpow2.f32 %v850_v61  ;;  %v2135_v61 = vld [vmem:[%s2903_s16 + $0x50] sm:$0xff] }
 0x5b4   :  { %2209 = vpow2.f32 %v852_v3 }
 0x5b7   :  { %v2204_v5 = vpop.eup %2203 }
 0x5b8   :  { %v2206_v6 = vpop.eup %2205 }
 0x5b9   :  { %v2208_v7 = vpop.eup %2207  ;;  %v859_v62 = vpack.c.bf16 %v2204_v5, %v2206_v6 }
 0x5ba   :  { %v2210_v63 = vpop.eup %2209 }
 0x5bb   :  { %866 = vmatpush.bf16.msra.mxu3 %v859_v62  ;;  %v858_v0 = vpack.c.bf16 %v2210_v63, %v2208_v7 }
 0x5bf   :  { %867 = vmatpush.bf16.msra.mxu3 %v858_v0 }
 0x5c2   :  { %1801 = vmatmul.msk.bf16.vlgmr.msra.gmra.mxu3 %vm557_vm1, %v2554_v13 }
 0x645   :  { %v869_v2 = vpop.f32.mrf.mxu3 }
 0x64d   :  { %v871_v4 = vpop.f32.mrf.mxu3 }
 0x64e   :  { %v874_v8 = vpack.c.bf16 %v871_v4, %v869_v2  ;;  %v2182_v2 = vld [vmem:[%s2904_s17 + $0x1] ss:$0 sm:$0xff] }
 0x650   :  { %882 = vmatpush.bf16.msrb.mxu0 %v874_v8 }
 0x653   :  { %1802 = vmatmul.msk.bf16.vlgmr.msrb.gmra.mxu0 %vm467_vm0, %v2491_v1 }
 0x663   :  { %1803 = vmatmul.msk.bf16.gmra.mxu0 %vm467_vm0, %v2515_v10 }
 0x6d0   :  { %v884_v12 = vpop.f32.mrf.mxu0 }
 0x6d1   :  { %v894_v28 = vmax.f32 %v884_v12, 1e-12 }
 0x6d8   :  { %v886_v14 = vpop.f32.mrf.mxu0 }
 0x6d9   :  { %v895_v26 = vmax.f32 %v886_v14, 1e-12 }
 0x6e0   :  { %v889_v20 = vpop.f32.mrf.mxu0 }
 0x6e1   :  { %v896_v23 = vmax.f32 %v889_v20, 1e-12 }
 0x6e3   :  { %2211 = vrcp.f32 %v896_v23 }
 0x6e4   :  { %2213 = vrcp.f32 %v895_v26 }
 0x6e5   :  { %2215 = vrcp.f32 %v894_v28 }
 0x6e8   :  { %v891_v29 = vpop.f32.mrf.mxu0 }
 0x6e9   :  { %v897_v30 = vmax.f32 %v891_v29, 1e-12  ;;  %v2212_v33 = vpop.eup %2211 }
 0x6ea   :  { %v2214_v39 = vpop.eup %2213  ;;  %v904_v44 = vmul.f32 %v2212_v33, %v2206_v6 }
 0x6eb   :  { %2217 = vrcp.f32 %v897_v30  ;;  %v2216_v43 = vpop.eup %2215  ;;  %v903_v48 = vmul.f32 %v2214_v39, %v2210_v63 }
 0x6ec   :  { %v908_v49 = vmul.f32 %v904_v44, %v2648_v41  ;;  %v902_v51 = vmul.f32 %v2216_v43, %v2208_v7  ;;  %v2126_v41 = vld [vmem:[%s2901_s14 + $0x48] sm:$0xff] }
 0x6ed   :  { %v907_v38 = vmul.f32 %v903_v48, %v2643_v36  ;;  %1003 = vmatpush.bf16.msrb.mxu2 %v2126_v41  ;;  %v2125_v36 = vld [vmem:[%s2901_s14 + $0x40] sm:$0xff] }
 0x6ee   :  { %v906_v35 = vmul.f32 %v902_v51, %v2646_v40  ;;  %v2140_v40 = vld [vmem:[%s2903_s16 + $0x78] sm:$0xff] }
 0x6f0   :  { %v910_v37 = vpack.c.bf16 %v907_v38, %v906_v35 }
 0x6f1   :  { %v2218_v45 = vpop.eup %2217  ;;  %1004 = vmatpush.bf16.msrb.mxu2 %v2125_v36 }
 0x6f2   :  { %v905_v47 = vmul.f32 %v2218_v45, %v2204_v5  ;;  %v1129_v45 = vstv %s1903_s10 }
 0x6f4   :  { %v909_v50 = vmul.f32 %v905_v47, %v2651_v46  ;;  %v2139_v46 = vld [vmem:[%s2903_s16 + $0x70] sm:$0xff] }
 0x6f6   :  { %v911_v52 = vpack.c.bf16 %v909_v50, %v908_v49 }
 0x6f8   :  { %918 = vmatpush.bf16.msrb.mxu3 %v911_v52 }
 0x6fc   :  { %919 = vmatpush.bf16.msrb.mxu3 %v910_v37 }
 0x6ff   :  { %1804 = vmatmul.msk.bf16.vlgmr.msrb.gmra.mxu3 %vm557_vm1, %v2554_v13 }
 0x700   :  { %1084 = vmatpush.bf16.msra.mxu3 %v2140_v40 }
 0x704   :  { %1085 = vmatpush.bf16.msra.mxu3 %v2139_v46 }
 0x708   :  { %1086 = vmatpush.bf16.msra.mxu3 %v2138_v53 }
 0x70c   :  { %1087 = vmatpush.bf16.msra.mxu3 %v2137_v54 }
 0x710   :  { %1088 = vmatpush.bf16.msra.mxu3 %v2136_v60 }
 0x714   :  { %1089 = vmatpush.bf16.msra.mxu3 %v2135_v61 }
 0x718   :  { %1090 = vmatpush.bf16.msra.mxu3 %v2134_v15 }
 0x71c   :  { %1091 = vmatpush.bf16.msra.mxu3 %v2133_v17 }
 0x782   :  { %v921_v55 = vpop.f32.mrf.mxu3 }
 0x783   :  { %v922_v57 = vadd.f32 %v921_v55, %v801_v18 }
 0x78a   :  { %v923_v56 = vpop.f32.mrf.mxu3 }
 0x78b   :  { %v924_v58 = vadd.f32 %v923_v56, %v802_v19  ;;  %v2181_v19 = vld [vmem:[%s2902_s15 + $0x1] ss:$0 sm:$0xff] }
 0x78d   :  { %v945_v59 = vpack.c.bf16 %v924_v58, %v922_v57 }
 0x78f   :  { %1005 = vmatmul.bf16.vlgmr.msrb.gmra.mxu2 %v945_v59 }
 0x812   :  { %v1006_v18 = vpop.f32.mrf.mxu2 }
 0x813   :  { %v1007_v3 = vadd.f32 %v2181_v19, %v1006_v18 }
 0x815   :  { %v1011_v7 = vmax.f32 %v1007_v3, 0.0 }
 0x81a   :  { %v1008_v5 = vpop.f32.mrf.mxu2 }
 0x81b   :  { %v1009_v6 = vadd.f32 %v2181_v19, %v1008_v5 }
 0x81d   :  { %v1012_v62 = vmax.f32 %v1009_v6, 0.0  ;;  %v2148_v6 = vld [vmem:[%s2901_s14 + $0xb8] sm:$0xff] }
 0x81f   :  { %v1032_v63 = vpack.c.bf16 %v1012_v62, %v1011_v7  ;;  %v2147_v62 = vld [vmem:[%s2901_s14 + $0xb0] sm:$0xff] }
 0x821   :  { %1092 = vmatmul.bf16.vlgmr.msra.gmra.mxu3 %v1032_v63 }
 0x8a4   :  { %v1093_v0 = vpop.f32.mrf.mxu3 }
 0x8a5   :  { %v2726_v4 = vadd.f32 %v2182_v2, %v1093_v0 }
 0x8a7   :  { %v1098_v14 = vmax.f32 %v2726_v4, 0.0  ;;  %v2150_v4 = vld [vmem:[%s2903_s16 + $0x88] sm:$0xff] }
 0x8ac   :  { %v1095_v8 = vpop.f32.mrf.mxu3 }
 0x8ad   :  { %v2728_v12 = vadd.f32 %v2182_v2, %v1095_v8 }
 0x8af   :  { %v1099_v16 = vmax.f32 %v2728_v12, 0.0  ;;  %v2149_v12 = vld [vmem:[%s2903_s16 + $0x80] sm:$0xff] }
 0x8b1   :  { %v1101_v20 = vpack.c.bf16 %v1099_v16, %v1098_v14 }
 0x8b3   :  { %1109 = vmatpush.bf16.msrb.mxu1 %v1101_v20  ;;  %v2145_v20 = vld [vmem:[%s2901_s14 + $0xa0] sm:$0xff] }
 0x8b6   :  { %1904 = vmatmul.msk.bf16.vlgmr.msrb.gmra.mxu1 %vm467_vm0, %v2510_v9 }
 0x8b7   :  { %1294 = vmatpush.bf16.msra.mxu1 %v2148_v6  ;;  %v2172_v6 = vld [vmem:[%s2907_s20 + $0x38] sm:$0xff] }
 0x8bb   :  { %1295 = vmatpush.bf16.msra.mxu1 %v2147_v62  ;;  %v2170_v62 = vld [vmem:[%s2907_s20 + $0x28] sm:$0xff] }
 0x8c6   :  { %1905 = vmatmul.msk.bf16.gmra.mxu1 %vm467_vm0, %v2523_v11 }
 0x933   :  { %v1111_v22 = vpop.f32.mrf.mxu1 }
 0x934   :  { %v1112_v28 = vadd.f32 %v1111_v22, %v2532_v24 }
 0x936   :  { %v1121_v31 = vmax.f32 %v1112_v28, 0.0 }
 0x938   :  { %v2746_v43 = vadd.f32 1e-07, %v1121_v31 }
 0x93b   :  { %v1113_v23 = vpop.f32.mrf.mxu1 }
 0x93c   :  { %v1114_v27 = vadd.f32 %v1113_v23, %v2530_v21  ;;  %v2144_v23 = vld [vmem:[%s2901_s14 + $0x98] sm:$0xff] }
 0x93e   :  { %v1122_v30 = vmax.f32 %v1114_v27, 0.0 }
 0x940   :  { %v2743_v39 = vadd.f32 1e-07, %v1122_v30 }
 0x942   :  { %v1131_v21 = vmul.f32 %v1129_v45, %v2743_v39 }
 0x943   :  { %v1116_v26 = vpop.f32.mrf.mxu1 }
 0x944   :  { %v1117_v29 = vadd.f32 %v1116_v26, %v2534_v25  ;;  %v1130_v25 = vmul.f32 %v1129_v45, %v2746_v43 }
 0x946   :  { %v1123_v33 = vmax.f32 %v1117_v29, 0.0  ;;  %v1134_v49 = vmax.f32 %v1130_v25, %v1131_v21 }
 0x948   :  { %v2748_v11 = vadd.f32 1e-07, %v1123_v33 }
 0x94a   :  { %v1132_v47 = vmul.f32 %v1129_v45, %v2748_v11 }
 0x94b   :  { %v1118_v34 = vpop.f32.mrf.mxu1 }
 0x94c   :  { %v1119_v9 = vadd.f32 %v1118_v34, %v2539_v32 }
 0x94e   :  { %v1124_v44 = vmax.f32 %v1119_v9, 0.0 }
 0x950   :  { %v2751_v24 = vadd.f32 1e-07, %v1124_v44 }
 0x952   :  { %v1133_v48 = vmul.f32 %v1129_v45, %v2751_v24 }
 0x954   :  { %v1135_v50 = vmax.f32 %v1132_v47, %v1133_v48 }
 0x956   :  { %v1136_v51 = vmax.f32 %v1134_v49, %v1135_v50 }
 0x958   :  { %v1137_v32 = vrot.slane %v1136_v51, 4 }
 0x95a   :  { %v1138_v52 = vmax.f32 %v1136_v51, %v1137_v32 }
 0x95c   :  { %v1139_v38 = vrot.slane %v1138_v52, 2 }
 0x95e   :  { %v1140_v35 = vmax.f32 %v1138_v52, %v1139_v38  ;;  %v2152_v38 = vld [vmem:[%s2903_s16 + $0x98] sm:$0xff] }
 0x960   :  { %v1141_v37 = vrot.slane %v1140_v35, 1 }
 0x962   :  { %v1142_v42 = vmax.f32 %v1140_v35, %v1141_v37  ;;  %v2151_v35 = vld [vmem:[%s2903_s16 + $0x90] sm:$0xff] }
 0x964   :  { %v1146_v41 = vsub.f32 %v1133_v48, %v1142_v42  ;;  %v1145_v36 = vsub.f32 %v1132_v47, %v1142_v42  ;;  %v1143_v40 = vsub.f32 %v1130_v25, %v1142_v42  ;;  %v1144_v46 = vsub.f32 %v1131_v21, %v1142_v42  ;;  %v2143_v47 = vld [vmem:[%s2901_s14 + $0x90] sm:$0xff]  ;;  %v2153_v48 = vld [vmem:[%s2903_s16 + $0xa0] sm:$0xff] }
 0x966   :  { %v1153_v53 = vmul.f32 1.442695, %v1146_v41  ;;  %v1151_v54 = vmul.f32 1.442695, %v1145_v36  ;;  %v1147_v55 = vmul.f32 1.442695, %v1143_v40 }
 0x967   :  { %v1149_v56 = vmul.f32 1.442695, %v1144_v46 }
 0x968   :  { %2219 = vpow2.f32 %v1153_v53  ;;  %v2164_v53 = vld [vmem:[%s2905_s18 + $0x38] sm:$0xff] }
 0x969   :  { %2221 = vpow2.f32 %v1151_v54  ;;  %v2163_v54 = vld [vmem:[%s2905_s18 + $0x30] sm:$0xff] }
 0x96a   :  { %2223 = vpow2.f32 %v1147_v55  ;;  %v2162_v55 = vld [vmem:[%s2905_s18 + $0x28] sm:$0xff] }
 0x96b   :  { %2225 = vpow2.f32 %v1149_v56  ;;  %v2161_v56 = vld [vmem:[%s2905_s18 + $0x20] sm:$0xff] }
 0x96e   :  { %v2220_v57 = vpop.eup %2219 }
 0x96f   :  { %v2222_v58 = vpop.eup %2221 }
 0x970   :  { %v2224_v59 = vpop.eup %2223  ;;  %v1156_v60 = vpack.c.bf16 %v2220_v57, %v2222_v58 }
 0x971   :  { %v2226_v61 = vpop.eup %2225 }
 0x972   :  { %1163 = vmatpush.bf16.msra.mxu0 %v1156_v60  ;;  %v1155_v15 = vpack.c.bf16 %v2226_v61, %v2224_v59  ;;  %v2184_v60 = vld [vmem:[%s2904_s17 + $0x2] ss:$0 sm:$0xff] }
 0x976   :  { %1164 = vmatpush.bf16.msra.mxu0 %v1155_v15 }
 0x979   :  { %1906 = vmatmul.msk.bf16.vlgmr.msra.gmra.mxu0 %vm557_vm1, %v2554_v13 }
 0x9f6   :  { %v1166_v17 = vpop.f32.mrf.mxu0 }
 0x9fe   :  { %v1168_v18 = vpop.f32.mrf.mxu0 }
 0x9ff   :  { %v1171_v19 = vpack.c.bf16 %v1168_v18, %v1166_v17 }
 0xa01   :  { %1179 = vmatpush.bf16.msra.mxu2 %v1171_v19 }
 0xa04   :  { %1907 = vmatmul.msk.bf16.vlgmr.msra.gmra.mxu2 %vm467_vm0, %v2491_v1  ;;  %v2146_v1 = vld [vmem:[%s2901_s14 + $0xa8] sm:$0xff] }
 0xa05   :  { %1296 = vmatpush.bf16.msra.mxu1 %v2146_v1  ;;  %1482 = vmatpush.bf16.msrb.mxu2 %v2164_v53  ;;  %v2167_v1 = vld [vmem:[%s2907_s20 + $0x10] sm:$0xff] }
 0xa09   :  { %1297 = vmatpush.bf16.msra.mxu1 %v2145_v20  ;;  %1483 = vmatpush.bf16.msrb.mxu2 %v2163_v54  ;;  %v2166_v20 = vld [vmem:[%s2907_s20 + $0x8] sm:$0xff] }
 0xa0d   :  { %1298 = vmatpush.bf16.msra.mxu1 %v2144_v23  ;;  %1484 = vmatpush.bf16.msrb.mxu2 %v2162_v55  ;;  %v2185_v23 = vld [vmem:[%s2906_s19] ss:$0 sm:$0xff] }
 0xa11   :  { %1299 = vmatpush.bf16.msra.mxu1 %v2143_v47  ;;  %1485 = vmatpush.bf16.msrb.mxu2 %v2161_v56 }
 0xa14   :  { %1908 = vmatmul.msk.bf16.gmra.mxu2 %vm467_vm0, %v2515_v10 }
 0xa87   :  { %v1181_v3 = vpop.f32.mrf.mxu2 }
 0xa88   :  { %v1191_v10 = vmax.f32 %v1181_v3, 1e-12  ;;  %v1395_v3 = vld [vmem:[%s2928_s6] sm:$0xf] }
 0xa8f   :  { %v1183_v5 = vpop.f32.mrf.mxu2 }
 0xa90   :  { %v1192_v0 = vmax.f32 %v1183_v5, 1e-12  ;;  %v2157_v5 = vld [vmem:[%s2905_s18] sm:$0xff] }
 0xa97   :  { %v1186_v7 = vpop.f32.mrf.mxu2 }
 0xa98   :  { %v1193_v63 = vmax.f32 %v1186_v7, 1e-12  ;;  %v2171_v7 = vld [vmem:[%s2907_s20 + $0x30] sm:$0xff] }
 0xa9a   :  { %2227 = vrcp.f32 %v1193_v63  ;;  %v2169_v63 = vld [vmem:[%s2907_s20 + $0x20] sm:$0xff] }
 0xa9b   :  { %2229 = vrcp.f32 %v1192_v0  ;;  %v2168_v0 = vld [vmem:[%s2907_s20 + $0x18] sm:$0xff] }
 0xa9c   :  { %2231 = vrcp.f32 %v1191_v10 }
 0xa9f   :  { %v1188_v2 = vpop.f32.mrf.mxu2 }
 0xaa0   :  { %v1194_v8 = vmax.f32 %v1188_v2, 1e-12  ;;  %v2228_v22 = vpop.eup %2227 }
 0xaa1   :  { %v2230_v26 = vpop.eup %2229  ;;  %v1201_v28 = vmul.f32 %v2228_v22, %v2222_v58  ;;  %v2165_v22 = vld [vmem:[%s2907_s20] sm:$0xff] }
 0xaa2   :  { %2233 = vrcp.f32 %v1194_v8  ;;  %v2232_v27 = vpop.eup %2231  ;;  %v1200_v31 = vmul.f32 %v2230_v26, %v2226_v61  ;;  %v2158_v61 = vld [vmem:[%s2905_s18 + $0x8] sm:$0xff] }
 0xaa3   :  { %v1205_v33 = vmul.f32 %v1201_v28, %v2748_v11  ;;  %v1199_v9 = vmul.f32 %v2232_v27, %v2224_v59  ;;  %v2142_v11 = vld [vmem:[%s2901_s14 + $0x88] sm:$0xff]  ;;  %v2159_v59 = vld [vmem:[%s2905_s18 + $0x10] sm:$0xff] }
 0xaa4   :  { %v1204_v45 = vmul.f32 %v1200_v31, %v2743_v39  ;;  %1300 = vmatpush.bf16.msra.mxu1 %v2142_v11  ;;  %v2141_v39 = vld [vmem:[%s2901_s14 + $0x80] sm:$0xff] }
 0xaa5   :  { %v1203_v21 = vmul.f32 %v1199_v9, %v2746_v43  ;;  %v2156_v43 = vld [vmem:[%s2903_s16 + $0xb8] sm:$0xff]  ;;  %v2186_v31 = vld [vmem:[%s2908_s21] ss:$0 sm:$0xff] }
 0xaa6   :  { %1381 = vmatpush.bf16.msrb.mxu0 %v2156_v43 }
 0xaa7   :  { %v1207_v25 = vpack.c.bf16 %v1204_v45, %v1203_v21 }
 0xaa8   :  { %v2234_v29 = vpop.eup %2233  ;;  %1301 = vmatpush.bf16.msra.mxu1 %v2141_v39 }
 0xaa9   :  { %v1202_v30 = vmul.f32 %v2234_v29, %v2220_v57  ;;  %v2160_v57 = vld [vmem:[%s2905_s18 + $0x18] sm:$0xff] }
 0xaaa   :  { %1486 = vmatpush.bf16.msrb.mxu2 %v2160_v57 }
 0xaab   :  { %v1206_v34 = vmul.f32 %v1202_v30, %v2751_v24  ;;  %v2154_v24 = vld [vmem:[%s2903_s16 + $0xa8] sm:$0xff] }
 0xaac   :  { %1565 = vmatpush.bf16.msrb.mxu1 %v2172_v6 }
 0xaad   :  { %v1208_v44 = vpack.c.bf16 %v1206_v34, %v1205_v33 }
 0xaae   :  { %1487 = vmatpush.bf16.msrb.mxu2 %v2159_v59 }
 0xaaf   :  { %1215 = vmatpush.bf16.msrb.mxu3 %v1208_v44 }
 0xab0   :  { %1566 = vmatpush.bf16.msrb.mxu1 %v2171_v7 }
 0xab2   :  { %1488 = vmatpush.bf16.msrb.mxu2 %v2158_v61 }
 0xab3   :  { %1216 = vmatpush.bf16.msrb.mxu3 %v1207_v25 }
 0xab4   :  { %1567 = vmatpush.bf16.msrb.mxu1 %v2170_v62 }
 0xab6   :  { %1909 = vmatmul.msk.bf16.vlgmr.msrb.gmra.mxu3 %vm557_vm1, %v2554_v13  ;;  %v2155_v13 = vld [vmem:[%s2903_s16 + $0xb0] sm:$0xff]  ;;  %1489 = vmatpush.bf16.msrb.mxu2 %v2157_v5 }
 0xab7   :  { %1382 = vmatpush.bf16.msrb.mxu0 %v2155_v13 }
 0xab8   :  { %1568 = vmatpush.bf16.msrb.mxu1 %v2169_v63 }
 0xabb   :  { %1383 = vmatpush.bf16.msrb.mxu0 %v2154_v24 }
 0xabc   :  { %1569 = vmatpush.bf16.msrb.mxu1 %v2168_v0 }
 0xabf   :  { %1384 = vmatpush.bf16.msrb.mxu0 %v2153_v48 }
 0xac0   :  { %1570 = vmatpush.bf16.msrb.mxu1 %v2167_v1 }
 0xac3   :  { %1385 = vmatpush.bf16.msrb.mxu0 %v2152_v38 }
 0xac4   :  { %1571 = vmatpush.bf16.msrb.mxu1 %v2166_v20 }
 0xac7   :  { %1386 = vmatpush.bf16.msrb.mxu0 %v2151_v35 }
 0xac8   :  { %1572 = vmatpush.bf16.msrb.mxu1 %v2165_v22 }
 0xacb   :  { %1387 = vmatpush.bf16.msrb.mxu0 %v2150_v4 }
 0xacf   :  { %1388 = vmatpush.bf16.msrb.mxu0 %v2149_v12 }
 0xb39   :  { %v1218_v49 = vpop.f32.mrf.mxu3 }
 0xb3a   :  { %v1219_v51 = vadd.f32 %v1218_v49, %v1098_v14 }
 0xb41   :  { %v1220_v50 = vpop.f32.mrf.mxu3 }
 0xb42   :  { %v1221_v32 = vadd.f32 %v1220_v50, %v1099_v16  ;;  %v2183_v16 = vld [vmem:[%s2902_s15 + $0x2] ss:$0 sm:$0xff] }
 0xb44   :  { %v1242_v52 = vpack.c.bf16 %v1221_v32, %v1219_v51 }
 0xb46   :  { %1302 = vmatmul.bf16.vlgmr.msra.gmra.mxu1 %v1242_v52 }
 0xbc3   :  { %v1303_v14 = vpop.f32.mrf.mxu1 }
 0xbc4   :  { %v1304_v37 = vadd.f32 %v2183_v16, %v1303_v14 }
 0xbc6   :  { %v1308_v36 = vmax.f32 %v1304_v37, 0.0 }
 0xbcb   :  { %v1305_v42 = vpop.f32.mrf.mxu1 }
 0xbcc   :  { %v1306_v41 = vadd.f32 %v2183_v16, %v1305_v42 }
 0xbce   :  { %v1309_v40 = vmax.f32 %v1306_v41, 0.0 }
 0xbd0   :  { %v1329_v46 = vpack.c.bf16 %v1309_v40, %v1308_v36 }
 0xbd2   :  { %1389 = vmatmul.bf16.vlgmr.msrb.gmra.mxu0 %v1329_v46 }
 0xc4f   :  { %v1390_v58 = vpop.f32.mrf.mxu0 }
 0xc50   :  { %v1391_v17 = vadd.f32 %v2184_v60, %v1390_v58 }
 0xc57   :  { %v1392_v15 = vpop.f32.mrf.mxu0 }
 0xc58   :  { %v1393_v18 = vadd.f32 %v2184_v60, %v1392_v15 }
 0xc5a   :  { %v1396_v19 = vpack.c.bf16 %v1393_v18, %v1391_v17 }
 0xc5c   :  { %1407 = vmatpush.bf16.msra.mxu3 %v1396_v19 }
 0xc5f   :  { %2008 = vmatmul.msk.bf16.vlgmr.msra.gmra.mxu3 %vm467_vm0, %v1395_v3 }
 0xce2   :  { %v1409_v10 = vpop.f32.mrf.mxu3 }
 0xce3   :  { %v1430_v2 = vpack.c.bf16 %v1409_v10, %v1409_v10 }
 0xce5   :  { %1490 = vmatmul.bf16.vlgmr.msrb.gmra.mxu2 %v1430_v2 }
 0xcea   :  { %v1411_v8 = vpop.f32.mrf.mxu3 }
 0xd68   :  { %v1491_v26 = vpop.f32.mrf.mxu2 }
 0xd69   :  { %v1492_v27 = vadd.f32 %v2185_v23, %v1491_v26 }
 0xd6b   :  { %v1495_v28 = vmax.f32 %v1492_v27, 0.0 }
 0xd6d   :  { %v1513_v29 = vpack.c.bf16 %v1495_v28, %v1495_v28 }
 0xd6f   :  { %1573 = vmatmul.bf16.vlgmr.msrb.gmra.mxu1 %v1513_v29 }
 0xd70   :  { %v1493_v30 = vpop.f32.mrf.mxu2 }
 0xdec   :  { %v1574_v33 = vpop.f32.mrf.mxu1 }
 0xded   :  { %v1575_v34 = vadd.f32 %v2186_v31, %v1574_v33 }
 0xdef   :  { %1578 = vst [vmem:[%s2909_s22] sm:$0xff] %v1575_v34 }
 0xdf4   :  { %v1576_v9 = vpop.f32.mrf.mxu1 }
 0xdf5   :  { %1583 = vsyncpa [#allocation3], 1 }

</bundles_post_ra>
